<compile_context>
chip_gen: v5e
topology: v5e:2x2
jax: 0.10.0
libtpu: 0.0.40
codegen_flags: <defaults>
</compile_context>

<pallas_src>
import functools

import jax
import jax.numpy as jnp
from jax.experimental import pallas as pl
from jax.experimental.pallas import tpu as pltpu


def ode_func_kernel(t_ref, x_ref, w1_ref, wt_ref, b1_ref, w2_ref, b2_ref,
                    dx_ref, *, bf16_act):
    # Per-row time, f32 elementwise path.
    t = t_ref[...].astype(jnp.float32)                          # (TB, 1)

    # First matmul: bf16 operands, f32 accumulation on the MXU.
    h_pre = jnp.dot(x_ref[...].astype(jnp.bfloat16),
                    w1_ref[...].astype(jnp.bfloat16),
                    preferred_element_type=jnp.float32)          # (TB, H)
    h_pre = h_pre + t * wt_ref[...] + b1_ref[...]                # f32 elementwise

    if bf16_act:
        # v6e/v7x: result feeds a bf16 matmul anyway -> tanh in bf16 (EUP 2x).
        h = jnp.tanh(h_pre.astype(jnp.bfloat16))
    else:
        # v5e: no bf16 VPU/EUP -> keep tanh in f32, truncate afterwards.
        h = jnp.tanh(h_pre).astype(jnp.bfloat16)

    # Second matmul: bf16 operands, f32 accumulation.
    d = jnp.dot(h, w2_ref[...].astype(jnp.bfloat16),
                preferred_element_type=jnp.float32)              # (TB, D)

    # Outer tanh from SimpleHiddenStateODEFunc.forward (f32, then store dtype).
    dx_ref[...] = jnp.tanh(d + b2_ref[...]).astype(dx_ref.dtype)


def _round_up(n, m):
    return ((n + m - 1) // m) * m


def _bf16_tanh_ok():
    """bf16 transcendentals are profitable/available on v6e & v7x only."""
    try:
        kind = jax.devices()[0].device_kind.lower()
    except Exception:
        return False
    return ("v6" in kind) or ("v7" in kind)


def simple_hidden_state_ode_forward(t, x, params, *, tb=1024, out_dtype=None):
    """tanh(dstate_net(t, x)) for a batch of rows.

    t: (rows,) per-row time, x: (rows, D) state.  Stack multiple solver-stage /
    time-step evaluations into `rows` (thousands, ideally) to amortize launch
    overhead and the one-time weight DMA.
    """
    rows, D = x.shape
    H = params["w1"].shape[1]
    out_dtype = x.dtype if out_dtype is None else out_dtype

    # Row tile: multiple of 8 sublanes, as large as the row count allows
    # (bigger tiles amortize the ~0.35us per-grid-step cost against HBM BW),
    # but capped so the row grid keeps >=4 tiles whenever that still leaves
    # >=256-row tiles (v7x has 2 TensorCores; a 1-tile grid idles one of them).
    rows8 = _round_up(rows, 8)
    tb_eff = min(_round_up(max(tb, 8), 8), rows8)
    quarter = _round_up(pl.cdiv(rows8, 4), 8)
    if quarter >= 256:
        tb_eff = min(tb_eff, quarter)
    grid = pl.cdiv(rows, tb_eff)   # ragged last block handled by OOB masking

    t_col = t.reshape(rows, 1).astype(jnp.float32)

    resident = lambda i: (0, 0)    # weights/biases: same block every grid step
    rowmap = lambda i: (i, 0)

    kernel = functools.partial(ode_func_kernel, bf16_act=_bf16_tanh_ok())

    return pl.pallas_call(
        kernel,
        out_shape=jax.ShapeDtypeStruct((rows, D), out_dtype),
        grid=(grid,),
        in_specs=[
            pl.BlockSpec((tb_eff, 1), rowmap),    # t  (lane dim == full dim 1)
            pl.BlockSpec((tb_eff, D), rowmap),    # x  (cast to bf16 in-kernel)
            pl.BlockSpec((D, H), resident),       # w1 (bf16, VMEM-resident)
            pl.BlockSpec((1, H), resident),       # wt (f32)
            pl.BlockSpec((1, H), resident),       # b1 (f32)
            pl.BlockSpec((H, D), resident),       # w2 (bf16, VMEM-resident)
            pl.BlockSpec((1, D), resident),       # b2 (f32)
        ],
        out_specs=pl.BlockSpec((tb_eff, D), rowmap),
        compiler_params=pltpu.CompilerParams(
            dimension_semantics=("parallel",)),   # no cross-tile accumulator
    )(t_col, x, params["w1"], params["wt"], params["b1"],
      params["w2"], params["b2"])


def ref_forward(t, x, params):
    w1 = params["w1"].astype(jnp.float32)
    w2 = params["w2"].astype(jnp.float32)
    h = jnp.tanh(x.astype(jnp.float32) @ w1
                 + t[:, None] * params["wt"] + params["b1"])
    return jnp.tanh(h @ w2 + params["b2"])


if __name__ == "__main__":
    # batch, solver stages batched together, feature, hidden.
    B, S, D, H = 128, 16, 128, 128          # rows = S*B = 2048 ODE-func evals

    key = jax.random.PRNGKey(0)
    kx, kt, kw1, kwt, kb1, kw2, kb2 = jax.random.split(key, 7)

    # Deterministic synthetic parameters; matmul weights stored in bf16 so the
    # (one-time) weight DMA is half-width.  Bias / time-projection stay f32.
    params = {
        "w1": (jax.random.normal(kw1, (D, H), jnp.float32)
               * (1.0 / D) ** 0.5).astype(jnp.bfloat16),
        "wt": jax.random.normal(kwt, (1, H), jnp.float32) * 0.1,
        "b1": jax.random.normal(kb1, (1, H), jnp.float32) * 0.01,
        "w2": (jax.random.normal(kw2, (H, D), jnp.float32)
               * (1.0 / H) ** 0.5).astype(jnp.bfloat16),
        "b2": jax.random.normal(kb2, (1, D), jnp.float32) * 0.01,
    }

    # Amortization: S solver-stage evaluations of the ODE func are stacked
    # into the row dimension and served by ONE pallas_call (weights DMA'd
    # once, resident across all grid steps).  2048 rows -> tb=512, 4 tiles.
    x = jax.random.normal(kx, (S * B, D), jnp.float32)
    t = jax.random.uniform(kt, (S * B,), jnp.float32, 0.0, 1.0)

    dx = simple_hidden_state_ode_forward(t, x, params)
    jax.block_until_ready(dx)

    ref = ref_forward(t, x, params)
    assert dx.shape == x.shape
    err = float(jnp.max(jnp.abs(dx.astype(jnp.float32) - ref)))
    assert jnp.allclose(dx.astype(jnp.float32), ref, atol=3e-2, rtol=3e-2), err

    print("KERNEL_OK")
</pallas_src>

<mosaic_0001>
module attributes {stable_mosaic.version = 11 : i64} {
  func.func @ode_func_kernel(%arg0: i32, %arg1: memref<512x1xf32, #tpu.memory_space<vmem>>, %arg2: memref<512x128xf32, #tpu.memory_space<vmem>>, %arg3: memref<128x128xbf16, #tpu.memory_space<vmem>>, %arg4: memref<1x128xf32, #tpu.memory_space<vmem>>, %arg5: memref<1x128xf32, #tpu.memory_space<vmem>>, %arg6: memref<128x128xbf16, #tpu.memory_space<vmem>>, %arg7: memref<1x128xf32, #tpu.memory_space<vmem>>, %arg8: memref<512x128xf32, #tpu.memory_space<vmem>>) attributes {dimension_semantics = [#tpu.dimension_semantics<parallel>], iteration_bounds = array<i64: 4>, scalar_prefetch = 0 : i64, scratch_operands = 0 : i64, tpu.core_type = #tpu.core_type<tc>, window_params = [{transform_indices = @transform_0, window_bounds = array<i64: 512, 1>}, {transform_indices = @transform_1, window_bounds = array<i64: 512, 128>}, {pipeline_mode = #tpu.pipeline_mode<synchronous>, transform_indices = @transform_2, window_bounds = array<i64: 128, 128>}, {pipeline_mode = #tpu.pipeline_mode<synchronous>, transform_indices = @transform_3, window_bounds = array<i64: 1, 128>}, {pipeline_mode = #tpu.pipeline_mode<synchronous>, transform_indices = @transform_4, window_bounds = array<i64: 1, 128>}, {pipeline_mode = #tpu.pipeline_mode<synchronous>, transform_indices = @transform_5, window_bounds = array<i64: 128, 128>}, {pipeline_mode = #tpu.pipeline_mode<synchronous>, transform_indices = @transform_6, window_bounds = array<i64: 1, 128>}, {transform_indices = @transform_7, window_bounds = array<i64: 512, 128>}]} {
    %c0 = arith.constant 0 : index
    %c0_0 = arith.constant 0 : index
    %0 = vector.load %arg1[%c0, %c0_0] : memref<512x1xf32, #tpu.memory_space<vmem>>, vector<512x1xf32>
    %c0_1 = arith.constant 0 : index
    %c0_2 = arith.constant 0 : index
    %1 = vector.load %arg2[%c0_1, %c0_2] : memref<512x128xf32, #tpu.memory_space<vmem>>, vector<512x128xf32>
    %2 = arith.truncf %1 : vector<512x128xf32> to vector<512x128xbf16>
    %c0_3 = arith.constant 0 : index
    %c0_4 = arith.constant 0 : index
    %3 = vector.load %arg3[%c0_3, %c0_4] : memref<128x128xbf16, #tpu.memory_space<vmem>>, vector<128x128xbf16>
    %cst = arith.constant dense<0.000000e+00> : vector<512x128xf32>
    %4 = tpu.matmul %2, %3, %cst {dimension_numbers = #tpu.dot_dimension_numbers<[1], [0], [0], [1], [0, 0, 1, 1], [], []>} : vector<512x128xbf16>, vector<128x128xbf16>, vector<512x128xf32> -> vector<512x128xf32>
    %c0_5 = arith.constant 0 : index
    %c0_6 = arith.constant 0 : index
    %5 = vector.load %arg4[%c0_5, %c0_6] : memref<1x128xf32, #tpu.memory_space<vmem>>, vector<1x128xf32>
    %6 = vector.broadcast %0 : vector<512x1xf32> to vector<512x128xf32>
    %7 = vector.broadcast %5 : vector<1x128xf32> to vector<512x128xf32>
    %8 = arith.mulf %6, %7 : vector<512x128xf32>
    %9 = arith.addf %4, %8 : vector<512x128xf32>
    %c0_7 = arith.constant 0 : index
    %c0_8 = arith.constant 0 : index
    %10 = vector.load %arg5[%c0_7, %c0_8] : memref<1x128xf32, #tpu.memory_space<vmem>>, vector<1x128xf32>
    %11 = vector.broadcast %10 : vector<1x128xf32> to vector<512x128xf32>
    %12 = arith.addf %9, %11 : vector<512x128xf32>
    %13 = math.tanh %12 : vector<512x128xf32>
    %14 = arith.truncf %13 : vector<512x128xf32> to vector<512x128xbf16>
    %c0_9 = arith.constant 0 : index
    %c0_10 = arith.constant 0 : index
    %15 = vector.load %arg6[%c0_9, %c0_10] : memref<128x128xbf16, #tpu.memory_space<vmem>>, vector<128x128xbf16>
    %cst_11 = arith.constant dense<0.000000e+00> : vector<512x128xf32>
    %16 = tpu.matmul %14, %15, %cst_11 {dimension_numbers = #tpu.dot_dimension_numbers<[1], [0], [0], [1], [0, 0, 1, 1], [], []>} : vector<512x128xbf16>, vector<128x128xbf16>, vector<512x128xf32> -> vector<512x128xf32>
    %c0_12 = arith.constant 0 : index
    %c0_13 = arith.constant 0 : index
    %17 = vector.load %arg7[%c0_12, %c0_13] : memref<1x128xf32, #tpu.memory_space<vmem>>, vector<1x128xf32>
    %18 = vector.broadcast %17 : vector<1x128xf32> to vector<512x128xf32>
    %19 = arith.addf %16, %18 : vector<512x128xf32>
    %20 = math.tanh %19 : vector<512x128xf32>
    %c0_14 = arith.constant 0 : index
    %c0_15 = arith.constant 0 : index
    %21 = vector.load %arg8[%c0_14, %c0_15] : memref<512x128xf32, #tpu.memory_space<vmem>>, vector<512x128xf32>
    tpu.vector_store %arg8[%c0_14, %c0_15], %20 {strides = array<i32>} : memref<512x128xf32, #tpu.memory_space<vmem>>, vector<512x128xf32>,
    return
  }
  func.func @transform_0(%arg0: i32) -> (i32, i32) {
    %c0_i32 = arith.constant 0 : i32
    %c0_i32_0 = arith.constant 0 : i32
    return %arg0, %c0_i32 : i32, i32
  }
  func.func @transform_1(%arg0: i32) -> (i32, i32) {
    %c0_i32 = arith.constant 0 : i32
    %c0_i32_0 = arith.constant 0 : i32
    return %arg0, %c0_i32 : i32, i32
  }
  func.func @transform_2(%arg0: i32) -> (i32, i32) {
    %c0_i32 = arith.constant 0 : i32
    %c0_i32_0 = arith.constant 0 : i32
    %c0_i32_1 = arith.constant 0 : i32
    return %c0_i32, %c0_i32_0 : i32, i32
  }
  func.func @transform_3(%arg0: i32) -> (i32, i32) {
    %c0_i32 = arith.constant 0 : i32
    %c0_i32_0 = arith.constant 0 : i32
    %c0_i32_1 = arith.constant 0 : i32
    return %c0_i32, %c0_i32_0 : i32, i32
  }
  func.func @transform_4(%arg0: i32) -> (i32, i32) {
    %c0_i32 = arith.constant 0 : i32
    %c0_i32_0 = arith.constant 0 : i32
    %c0_i32_1 = arith.constant 0 : i32
    return %c0_i32, %c0_i32_0 : i32, i32
  }
  func.func @transform_5(%arg0: i32) -> (i32, i32) {
    %c0_i32 = arith.constant 0 : i32
    %c0_i32_0 = arith.constant 0 : i32
    %c0_i32_1 = arith.constant 0 : i32
    return %c0_i32, %c0_i32_0 : i32, i32
  }
  func.func @transform_6(%arg0: i32) -> (i32, i32) {
    %c0_i32 = arith.constant 0 : i32
    %c0_i32_0 = arith.constant 0 : i32
    %c0_i32_1 = arith.constant 0 : i32
    return %c0_i32, %c0_i32_0 : i32, i32
  }
  func.func @transform_7(%arg0: i32) -> (i32, i32) {
    %c0_i32 = arith.constant 0 : i32
    %c0_i32_0 = arith.constant 0 : i32
    return %arg0, %c0_i32 : i32, i32
  }
}

</mosaic_0001>

<bundles_post_ra>
// kernel: tpu_custom_call.1
= control target key start
LH: loop header
LB: loop body
LE: loop exit
PB: predicated region body
PF: predicated region fallthrough
CT: control target
= control target key end

     0   :  { %12 = vsyncpa [#allocation3], 0  ;;  %s2916_s0 = inlined_call_operand.vmem [shape: f32[2048,1], index: 0, kind: input, shape index: {}]   ;;  %s2917_s1 = inlined_call_operand.vmem [shape: f32[2048,128], index: 1, kind: input, shape index: {}]   ;;  %s2918_s2 = inlined_call_operand.hbm [shape: bf16[128,128], index: 2, kind: input, shape index: {}]   ;;  %s2919_s3 = inlined_call_operand.vmem [shape: f32[1,128], index: 3, kind: input, shape index: {}]   ;;  %s2920_s4 = inlined_call_operand.vmem [shape: f32[1,128], index: 4, kind: input, shape index: {}]   ;;  %s2921_s5 = inlined_call_operand.hbm [shape: bf16[128,128], index: 5, kind: input, shape index: {}]   ;;  %s2922_s6 = inlined_call_operand.vmem [shape: f32[1,128], index: 6, kind: input, shape index: {}]   ;;  %s2923_s7 = inlined_call_operand.hbm [shape: f32[2048,128], index: 7, kind: output, shape index: {}]  }
   0x1   :  { %13 = vsyncpa [#allocation6], 0 }
   0x2   :  { %14 = vsyncpa [#allocation4], 0 }
   0x3   :  { %16 = vsyncpa [#allocation4 + $0x1], 0  ;;  %s2382_s24 = smov 0   ;;  %s2384_s25 = smov 0  }
   0x4   :  { %s2386_s26 = smov 0   ;;  %s2388_s27 = smov 0  }
   0x5 LB: > { %s2403_s28 = sadd.s32 4294967295, %s2333_s27   ;;  %s1758_s29 = sadd.s32 4294967294, %s2333_s27   ;;  %s2333_s27 = sphi %s2388_s27, %s2930_s27   ;;  %s2329_s26 = sphi %s2386_s26, %s2929_s26   ;;  %s2325_s25 = sphi %s2384_s25, %s2928_s25   ;;  %s2321_s24 = sphi %s2382_s24, %s2927_s24  }
   0x6   : > { %s2407_s30 = sadd.s32 1, %s2333_s27   ;;  %s186_s8 = sadd.s32 1, %s2329_s26 }
   0x7   : > { %s183_s9 = ssub.s32 %s2333_s27, %s2407_s30  ;;  %p196_p0 = scmp.ne.s32.totalorder %s2329_s26, %s2325_s25 }
   0x8   : > { %p184_p1 = scmp.eq.s32.totalorder %s183_s9, 0  ;;  %p197_p2 = scmp.eq.s32.totalorder %s2403_s28, 3 }
   0x9   : > { %p202_p3 = scmp.ne.s32.totalorder %s2325_s25, %s2321_s24  ;;  %p203_p4 = scmp.eq.s32.totalorder %s1758_s29, 3 }
   0xa   : > { %s2418_s10 = scalar_select %p184_p1, %s2329_s26, %s186_s8  }
   0xb   : > { %p2420_p5 = por %p197_p2, %p196_p0  ;;  %p2424_p6 = por %p203_p4, %p202_p3 }
   0xc   : > { %p1759_p7 = scmp.ge.s32.totalorder %s2333_s27, 1  ;;  %p210_p8 = scmp.lt.s32.totalorder %s2333_s27, 5 }
   0xd   : > { %p1894_p9 = scmp.eq.s32.totalorder %s2403_s28, 0  ;;  %s221_s16 = sshll.u32 %s2918_s2, 4  ;;  %s222_s16 = int_to_ptr.hbm [resolvable:$true] %s221_s16 }
   0xe   : > { %p2431_p10 = pnand %p1759_p7, %p210_p8  ;;  %s2335_s17 = smov [#allocation2]  }
   0xf   : > { %s223_s18 = sshll.u32 %s2335_s17, 4  ;;  %s241_s21 = sshll.u32 %s2921_s5, 4  ;;  %s224_s18 = int_to_ptr.vmem [resolvable:$true] %s223_s18  ;;  %s242_s21 = int_to_ptr.hbm [resolvable:$true] %s241_s21 }
  0x10   : > { %p1883_p11 = pneg %p2431_p10  ;;  %s2336_s22 = smov 64  }
  0x11   : > { %s2337_s23 = smov 4   ;;  %s2338_s29 = smov [#allocation5]  }
  0x12   : > { %p1884_p12 = pnand %p1894_p9, %p1883_p11  ;;  %s243_s8 = sshll.u32 %s2338_s29, 4  ;;  %s244_s8 = int_to_ptr.vmem [resolvable:$true] %s243_s8 }
  0x13   : > { %280 = sbr.rel (%p2431_p10) target bundleno = 608 (0x260), region = 48 }
  0x14   : > { %1886 = dma.hbm_to_vmem [thread:$0]  (!%p1884_p12), %s222_s16, 1024, %s224_s18, [#allocation3], %s2336_s22, %s2336_s22, %s2337_s23  }
  0x15   : > { %1889 = dma.hbm_to_vmem [thread:$0]  (!%p1884_p12), %s242_s21, 1024, %s244_s8, [#allocation6], %s2336_s22, %s2336_s22, %s2337_s23  }
  0x18   : > { %2308 = dma.done.wait (%p1894_p9), [#allocation3], 1024  }
  0x19   : > { %2310 = vsyncadd (%p1894_p9), [#allocation3], 4294966272 }
  0x1a   : > { %2312 = dma.done.wait (%p1894_p9), [#allocation6], 1024  }
  0x1b   : > { %2314 = vsyncadd (%p1894_p9), [#allocation6], 4294966272  ;;  %s1767_s9 = sshll.u32 %s2403_s28, 6  ;;  %v2339_v0 = vmov 0   ;;  %v1847_v4 = vld [vmem:[#allocation2 + $0x38] sm:$0xff]  ;;  %v1846_v5 = vld [vmem:[#allocation2 + $0x30] sm:$0xff] }
  0x1c   : > { %1940 = vset.pattern.permute.xlu2 %v2339_v0  ;;  %1939 = vset.pattern.permute.xlu1 %v2339_v0  ;;  %p324_p13 = scmp.lt.s32.totalorder %s1767_s9, 255  ;;  %v1845_v9 = vld [vmem:[#allocation2 + $0x28] sm:$0xff]  ;;  %v1844_v10 = vld [vmem:[#allocation2 + $0x20] sm:$0xff]  ;;  %v1843_v14 = vld [vmem:[#allocation2 + $0x18] sm:$0xff]  ;;  %s1856_s21 = sshll.u32 %s2403_s28, 9 }
  0x1d   : > { %1938 = vset.pattern.permute.xlu0 %v2339_v0  ;;  %948 = vmatpush.bf16.msra.mxu0 %v1847_v4  ;;  %v1842_v15 = vld [vmem:[#allocation2 + $0x10] sm:$0xff]  ;;  %v1841_v19 = vld [vmem:[#allocation2 + $0x8] sm:$0xff]  ;;  %v1840_v20 = vld [vmem:[#allocation2] sm:$0xff]  ;;  %s1658_s29 = scalar_lea.hbm %s2923_s7, %s1856_s21 }
  0x1e   : > { %s2932_s9 = smov (!%p324_p13, %s1767_s9), 255  ;;  %1857 = vmatpush.bf16.msra.mxu2 %v1847_v4 }
  0x1f   : > { %s1768_s13 = sshll.u32 %s2932_s9, 3  ;;  %s320_s9 = sand.u32 1, %s2325_s25  }
  0x20   : > { %s2464_s16 = scalar_lea.vmem %s2916_s0, %s1768_s13  ;;  %s2483_s19 = scalar_lea.vmem %s2917_s1, %s1768_s13 }
  0x21   : > { %v370_v1 = vld [vmem:[%s2464_s16 + $0x110] sm:$0xff]  ;;  %v368_v2 = vld [vmem:[%s2464_s16 + $0x100] sm:$0xff]  ;;  %v371_v6 = vld [vmem:[%s2464_s16 + $0x118] sm:$0xff]  ;;  %949 = vmatpush.bf16.msra.mxu0 %v1846_v5  ;;  %s1766_s13 = sshll.u32 %s320_s9, 9  ;;  %s1647_s15 = scalar_lea.sflag [#allocation4], %s320_s9 }
  0x22   : > { %v336_v3 = vld [vmem:[%s2464_s16] sm:$0xff]  ;;  %685 = vperm.xlu2 %1940, %v370_v1   ;;  %675 = vperm.xlu0 %1938, %v368_v2   ;;  %v369_v7 = vld [vmem:[%s2464_s16 + $0x108] sm:$0xff]  ;;  %v338_v12 = vld [vmem:[%s2464_s16 + $0x10] sm:$0xff]  ;;  %s2698_s14 = scalar_lea.vmem [#allocation7], %s1766_s13  ;;  %s1661_s13 = sshll.u32 %s1658_s29, 4  ;;  %s1662_s13 = int_to_ptr.hbm [resolvable:$true] %s1661_s13 }
  0x23   : > { %515 = vperm.xlu1 %1939, %v336_v3   ;;  %1858 = vmatpush.bf16.msra.mxu2 %v1846_v5  ;;  %v337_v8 = vld [vmem:[%s2464_s16 + $0x8] sm:$0xff]  ;;  %v372_v11 = vld [vmem:[%s2464_s16 + $0x120] sm:$0xff]  ;;  %v339_v13 = vld [vmem:[%s2464_s16 + $0x18] sm:$0xff]  ;;  %s1659_s8 = sshll.u32 %s2698_s14, 4  ;;  %s1660_s8 = int_to_ptr.vmem [resolvable:$true] %s1659_s8 }
  0x24   : > { %v341_v16 = vld [vmem:[%s2464_s16 + $0x28] sm:$0xff]  ;;  %v340_v18 = vld [vmem:[%s2464_s16 + $0x20] sm:$0xff]  ;;  %v342_v25 = vld [vmem:[%s2464_s16 + $0x30] sm:$0xff] }
  0x25   : > { %950 = vmatpush.bf16.msra.mxu0 %v1845_v9  ;;  %v373_v17 = vld [vmem:[%s2464_s16 + $0x128] sm:$0xff]  ;;  %v400_v21 = vld [vmem:[%s2483_s19] sm:$0xff]  ;;  %v374_v26 = vld [vmem:[%s2464_s16 + $0x130] sm:$0xff] }
  0x26   : > { %v401_v22 = vld [vmem:[%s2483_s19 + $0x8] sm:$0xff]  ;;  %v432_v23 = vld [vmem:[%s2483_s19 + $0x100] sm:$0xff]  ;;  %v375_v28 = vld [vmem:[%s2464_s16 + $0x138] sm:$0xff] }
  0x27   : > { %1859 = vmatpush.bf16.msra.mxu2 %v1845_v9  ;;  %v433_v24 = vld [vmem:[%s2483_s19 + $0x108] sm:$0xff]  ;;  %v464_v27 = vpack.c.bf16 %v401_v22, %v400_v21  ;;  %v343_v31 = vld [vmem:[%s2464_s16 + $0x38] sm:$0xff]  ;;  %v376_v32 = vld [vmem:[%s2464_s16 + $0x140] sm:$0xff] }
  0x28   : > { %v480_v29 = vpack.c.bf16 %v433_v24, %v432_v23  ;;  %v377_v30 = vld [vmem:[%s2464_s16 + $0x148] sm:$0xff]  ;;  %v402_v33 = vld [vmem:[%s2483_s19 + $0x10] sm:$0xff]  ;;  %v403_v34 = vld [vmem:[%s2483_s19 + $0x18] sm:$0xff] }
  0x29   : > { %951 = vmatpush.bf16.msra.mxu0 %v1844_v10  ;;  %v434_v35 = vld [vmem:[%s2483_s19 + $0x110] sm:$0xff]  ;;  %v435_v36 = vld [vmem:[%s2483_s19 + $0x118] sm:$0xff]  ;;  %v344_v38 = vld [vmem:[%s2464_s16 + $0x40] sm:$0xff]  ;;  %v465_v39 = vpack.c.bf16 %v403_v34, %v402_v33 }
  0x2a   : > { %690 = vperm.xlu2 %1940, %v371_v6   ;;  %680 = vperm.xlu0 %1938, %v369_v7   ;;  %v378_v37 = vld [vmem:[%s2464_s16 + $0x150] sm:$0xff]  ;;  %v345_v40 = vld [vmem:[%s2464_s16 + $0x48] sm:$0xff]  ;;  %v481_v41 = vpack.c.bf16 %v435_v36, %v434_v35  ;;  %v347_v42 = vld [vmem:[%s2464_s16 + $0x58] sm:$0xff] }
  0x2b   : > { %520 = vperm.xlu1 %1939, %v337_v8   ;;  %1860 = vmatpush.bf16.msra.mxu2 %v1844_v10  ;;  %v379_v43 = vld [vmem:[%s2464_s16 + $0x158] sm:$0xff]  ;;  %v346_v44 = vld [vmem:[%s2464_s16 + $0x50] sm:$0xff]  ;;  %v404_v45 = vld [vmem:[%s2483_s19 + $0x20] sm:$0xff] }
  0x2c   : > { %v405_v46 = vld [vmem:[%s2483_s19 + $0x28] sm:$0xff]  ;;  %v436_v47 = vld [vmem:[%s2483_s19 + $0x120] sm:$0xff]  ;;  %v383_v54 = vld [vmem:[%s2464_s16 + $0x178] sm:$0xff] }
  0x2d   : > { %952 = vmatpush.bf16.msra.mxu0 %v1843_v14  ;;  %v437_v48 = vld [vmem:[%s2483_s19 + $0x128] sm:$0xff]  ;;  %v348_v49 = vld [vmem:[%s2464_s16 + $0x60] sm:$0xff]  ;;  %v466_v51 = vpack.c.bf16 %v405_v46, %v404_v45  ;;  %v382_v56 = vld [vmem:[%s2464_s16 + $0x170] sm:$0xff] }
  0x2e   : > { %v380_v50 = vld [vmem:[%s2464_s16 + $0x160] sm:$0xff]  ;;  %v381_v52 = vld [vmem:[%s2464_s16 + $0x168] sm:$0xff]  ;;  %v482_v53 = vpack.c.bf16 %v437_v48, %v436_v47  ;;  %v406_v57 = vld [vmem:[%s2483_s19 + $0x30] sm:$0xff] }
  0x2f   : > { %1861 = vmatpush.bf16.msra.mxu2 %v1843_v14  ;;  %v349_v55 = vld [vmem:[%s2464_s16 + $0x68] sm:$0xff]  ;;  %v407_v58 = vld [vmem:[%s2483_s19 + $0x38] sm:$0xff]  ;;  %v438_v59 = vld [vmem:[%s2483_s19 + $0x130] sm:$0xff] }
  0x30   : > { %v439_v60 = vld [vmem:[%s2483_s19 + $0x138] sm:$0xff]  ;;  %v384_v61 = vld [vmem:[%s2464_s16 + $0x180] sm:$0xff]  ;;  %v350_v62 = vld [vmem:[%s2464_s16 + $0x70] sm:$0xff]  ;;  %v467_v63 = vpack.c.bf16 %v407_v58, %v406_v57 }
  0x31   : > { %953 = vmatpush.bf16.msra.mxu0 %v1842_v15  ;;  %v351_v0 = vld [vmem:[%s2464_s16 + $0x78] sm:$0xff]  ;;  %v483_v1 = vpack.c.bf16 %v439_v60, %v438_v59  ;;  %v353_v2 = vld [vmem:[%s2464_s16 + $0x88] sm:$0xff]  ;;  %v352_v4 = vld [vmem:[%s2464_s16 + $0x80] sm:$0xff] }
  0x32   : > { %695 = vperm.xlu2 %1940, %v372_v11   ;;  %525 = vperm.xlu0 %1938, %v338_v12   ;;  %v385_v3 = vld [vmem:[%s2464_s16 + $0x188] sm:$0xff]  ;;  %v408_v5 = vld [vmem:[%s2483_s19 + $0x40] sm:$0xff]  ;;  %v354_v9 = vld [vmem:[%s2464_s16 + $0x90] sm:$0xff] }
  0x33   : > { %530 = vperm.xlu1 %1939, %v339_v13   ;;  %1862 = vmatpush.bf16.msra.mxu2 %v1842_v15  ;;  %v409_v6 = vld [vmem:[%s2483_s19 + $0x48] sm:$0xff]  ;;  %v440_v7 = vld [vmem:[%s2483_s19 + $0x140] sm:$0xff]  ;;  %v386_v10 = vld [vmem:[%s2464_s16 + $0x190] sm:$0xff] }
  0x34   : > { %v441_v8 = vld [vmem:[%s2483_s19 + $0x148] sm:$0xff]  ;;  %v468_v11 = vpack.c.bf16 %v409_v6, %v408_v5  ;;  %v387_v12 = vld [vmem:[%s2464_s16 + $0x198] sm:$0xff]  ;;  %v390_v21 = vld [vmem:[%s2464_s16 + $0x1b0] sm:$0xff] }
  0x35   : > { %954 = vmatpush.bf16.msra.mxu0 %v1841_v19  ;;  %v484_v13 = vpack.c.bf16 %v441_v8, %v440_v7  ;;  %v389_v14 = vld [vmem:[%s2464_s16 + $0x1a8] sm:$0xff]  ;;  %v355_v15 = vld [vmem:[%s2464_s16 + $0x98] sm:$0xff]  ;;  %v356_v22 = vld [vmem:[%s2464_s16 + $0xa0] sm:$0xff] }
  0x36   : > { %v357_v24 = vld [vmem:[%s2464_s16 + $0xa8] sm:$0xff]  ;;  %v444_v33 = vld [vmem:[%s2483_s19 + $0x160] sm:$0xff]  ;;  %v394_v45 = vld [vmem:[%s2464_s16 + $0x1d0] sm:$0xff] }
  0x37   : > { %1863 = vmatpush.bf16.msra.mxu2 %v1841_v19  ;;  %v442_v19 = vld [vmem:[%s2483_s19 + $0x150] sm:$0xff]  ;;  %v445_v34 = vld [vmem:[%s2483_s19 + $0x168] sm:$0xff]  ;;  %v360_v36 = vld [vmem:[%s2464_s16 + $0xc0] sm:$0xff] }
  0x38   : > { %v1853_v35 = vld [vmem:[#allocation5 + $0x28] sm:$0xff]  ;;  %v1850_v46 = vld [vmem:[#allocation5 + $0x10] sm:$0xff]  ;;  %v415_v48 = vld [vmem:[%s2483_s19 + $0x78] sm:$0xff] }
  0x39   : > { %955 = vmatpush.bf16.msra.mxu0 %v1840_v20  ;;  %v414_v47 = vld [vmem:[%s2483_s19 + $0x70] sm:$0xff]  ;;  %v1848_v57 = vld [vmem:[#allocation5] sm:$0xff]  ;;  %v365_v58 = vld [vmem:[%s2464_s16 + $0xe8] sm:$0xff] }
  0x3a   : > { %540 = vperm.xlu2 %1940, %v341_v16   ;;  %700 = vperm.xlu0 %1938, %v373_v17   ;;  %v388_v16 = vld [vmem:[%s2464_s16 + $0x1a0] sm:$0xff]  ;;  %v410_v17 = vld [vmem:[%s2483_s19 + $0x50] sm:$0xff]  ;;  %v397_v59 = vld [vmem:[%s2464_s16 + $0x1e8] sm:$0xff] }
  0x3b   : > { %535 = vperm.xlu1 %1939, %v340_v18   ;;  %1864 = vmatpush.bf16.msra.mxu2 %v1840_v20  ;;  %v411_v18 = vld [vmem:[%s2483_s19 + $0x58] sm:$0xff]  ;;  %v364_v60 = vld [vmem:[%s2464_s16 + $0xe0] sm:$0xff]  ;;  %v366_v5 = vld [vmem:[%s2464_s16 + $0xf0] sm:$0xff] }
  0x3c   : > { %956 = vmatmul.bf16.vlgmr.msra.gmra.mxu0 %v464_v27  ;;  %v443_v20 = vld [vmem:[%s2483_s19 + $0x158] sm:$0xff]  ;;  %v469_v23 = vpack.c.bf16 %v411_v18, %v410_v17  ;;  %v398_v6 = vld [vmem:[%s2464_s16 + $0x1f0] sm:$0xff] }
  0x3d   : > { %v359_v27 = vld [vmem:[%s2464_s16 + $0xb8] sm:$0xff] }
  0x3e   : > { %1036 = vmatmul.bf16.vlgmr.msra.gmra.mxu2 %v480_v29  ;;  %v358_v29 = vld [vmem:[%s2464_s16 + $0xb0] sm:$0xff] }
  0x42   : > { %545 = vperm.xlu2 %1940, %v342_v25   ;;  %705 = vperm.xlu0 %1938, %v374_v26   ;;  %v485_v25 = vpack.c.bf16 %v443_v20, %v442_v19  ;;  %v1855_v26 = vld [vmem:[#allocation5 + $0x38] sm:$0xff] }
  0x43   : > { %710 = vperm.xlu1 %1939, %v375_v28   ;;  %v391_v28 = vld [vmem:[%s2464_s16 + $0x1b8] sm:$0xff]  ;;  %1349 = vmatpush.bf16.msra.mxu1 %v1855_v26 }
  0x44   : > { %1865 = vmatpush.bf16.msra.mxu3 %v1855_v26  ;;  %v367_v19 = vld [vmem:[%s2464_s16 + $0xf8] sm:$0xff] }
  0x45   : > { %v419_v26 = vld [vmem:[%s2483_s19 + $0x98] sm:$0xff] }
  0x4a   : > { %720 = vperm.xlu2 %1940, %v377_v30   ;;  %550 = vperm.xlu0 %1938, %v343_v31   ;;  %v1854_v30 = vld [vmem:[#allocation5 + $0x30] sm:$0xff]  ;;  %v412_v31 = vld [vmem:[%s2483_s19 + $0x60] sm:$0xff] }
  0x4b   : > { %715 = vperm.xlu1 %1939, %v376_v32   ;;  %v413_v32 = vld [vmem:[%s2483_s19 + $0x68] sm:$0xff]  ;;  %1350 = vmatpush.bf16.msra.mxu1 %v1854_v30 }
  0x4c   : > { %961 = vmatmul.bf16.gmra.mxu0 %v465_v39  ;;  %1866 = vmatpush.bf16.msra.mxu3 %v1854_v30  ;;  %v393_v39 = vld [vmem:[%s2464_s16 + $0x1c8] sm:$0xff] }
  0x4e   : > { %1041 = vmatmul.bf16.gmra.mxu2 %v481_v41  ;;  %v1852_v41 = vld [vmem:[#allocation5 + $0x20] sm:$0xff] }
  0x4f   : > { %1351 = vmatpush.bf16.msra.mxu1 %v1853_v35 }
  0x50   : > { %1867 = vmatpush.bf16.msra.mxu3 %v1853_v35 }
  0x52   : > { %725 = vperm.xlu2 %1940, %v378_v37   ;;  %555 = vperm.xlu0 %1938, %v344_v38   ;;  %v392_v37 = vld [vmem:[%s2464_s16 + $0x1c0] sm:$0xff]  ;;  %v470_v38 = vpack.c.bf16 %v413_v32, %v412_v31 }
  0x53   : > { %560 = vperm.xlu1 %1939, %v345_v40   ;;  %v486_v40 = vpack.c.bf16 %v445_v34, %v444_v33  ;;  %1352 = vmatpush.bf16.msra.mxu1 %v1852_v41 }
  0x54   : > { %1868 = vmatpush.bf16.msra.mxu3 %v1852_v41 }
  0x5a   : > { %570 = vperm.xlu2 %1940, %v347_v42   ;;  %730 = vperm.xlu0 %1938, %v379_v43   ;;  %v1851_v42 = vld [vmem:[#allocation5 + $0x18] sm:$0xff] }
  0x5b   : > { %565 = vperm.xlu1 %1939, %v346_v44   ;;  %v395_v43 = vld [vmem:[%s2464_s16 + $0x1d8] sm:$0xff]  ;;  %v361_v44 = vld [vmem:[%s2464_s16 + $0xc8] sm:$0xff]  ;;  %1353 = vmatpush.bf16.msra.mxu1 %v1851_v42 }
  0x5c   : > { %966 = vmatmul.bf16.gmra.mxu0 %v466_v51  ;;  %1869 = vmatpush.bf16.msra.mxu3 %v1851_v42  ;;  %v1849_v51 = vld [vmem:[#allocation5 + $0x8] sm:$0xff] }
  0x5e   : > { %1046 = vmatmul.bf16.gmra.mxu2 %v482_v53  ;;  %v362_v53 = vld [vmem:[%s2464_s16 + $0xd0] sm:$0xff] }
  0x5f   : > { %1354 = vmatpush.bf16.msra.mxu1 %v1850_v46 }
  0x60   : > { %1870 = vmatpush.bf16.msra.mxu3 %v1850_v46 }
  0x62   : > { %575 = vperm.xlu2 %1940, %v348_v49   ;;  %735 = vperm.xlu0 %1938, %v380_v50   ;;  %v446_v49 = vld [vmem:[%s2483_s19 + $0x170] sm:$0xff]  ;;  %v447_v50 = vld [vmem:[%s2483_s19 + $0x178] sm:$0xff] }
  0x63   : > { %740 = vperm.xlu1 %1939, %v381_v52   ;;  %v396_v52 = vld [vmem:[%s2464_s16 + $0x1e0] sm:$0xff]  ;;  %1355 = vmatpush.bf16.msra.mxu1 %v1849_v51 }
  0x64   : > { %1871 = vmatpush.bf16.msra.mxu3 %v1849_v51 }
  0x67   : > { %1356 = vmatpush.bf16.msra.mxu1 %v1848_v57 }
  0x68   : > { %1872 = vmatpush.bf16.msra.mxu3 %v1848_v57  ;;  %v420_v57 = vld [vmem:[%s2483_s19 + $0xa0] sm:$0xff] }
  0x6a   : > { %750 = vperm.xlu2 %1940, %v383_v54   ;;  %580 = vperm.xlu0 %1938, %v349_v55   ;;  %v471_v54 = vpack.c.bf16 %v415_v48, %v414_v47  ;;  %v363_v55 = vld [vmem:[%s2464_s16 + $0xd8] sm:$0xff] }
  0x6b   : > { %745 = vperm.xlu1 %1939, %v382_v56   ;;  %v487_v56 = vpack.c.bf16 %v447_v50, %v446_v49 }
  0x6c   : > { %971 = vmatmul.bf16.gmra.mxu0 %v467_v63  ;;  %v417_v63 = vld [vmem:[%s2483_s19 + $0x88] sm:$0xff] }
  0x6e   : > { %1051 = vmatmul.bf16.gmra.mxu2 %v483_v1 }
  0x72   : > { %755 = vperm.xlu2 %1940, %v384_v61   ;;  %585 = vperm.xlu0 %1938, %v350_v62   ;;  %v416_v62 = vld [vmem:[%s2483_s19 + $0x80] sm:$0xff] }
  0x73   : > { %590 = vperm.xlu1 %1939, %v351_v0   ;;  %v2570_v0 = vld [vmem:[%s2919_s3] ss:$0 sm:$0xff]  ;;  %v472_v7 = vpack.c.bf16 %v417_v63, %v416_v62 }
  0x7a   : > { %600 = vperm.xlu2 %1940, %v353_v2   ;;  %760 = vperm.xlu0 %1938, %v385_v3   ;;  %v448_v2 = vld [vmem:[%s2483_s19 + $0x180] sm:$0xff]  ;;  %v449_v3 = vld [vmem:[%s2483_s19 + $0x188] sm:$0xff] }
  0x7b   : > { %595 = vperm.xlu1 %1939, %v352_v4  }
  0x7c   : > { %976 = vmatmul.bf16.gmra.mxu0 %v468_v11  ;;  %v686_v20 = vpop.permute.xlu2 %685 }
  0x7e   : > { %1056 = vmatmul.bf16.gmra.mxu2 %v484_v13 }
  0x82   : > { %605 = vperm.xlu2 %1940, %v354_v9   ;;  %765 = vperm.xlu0 %1938, %v386_v10   ;;  %v399_v9 = vld [vmem:[%s2464_s16 + $0x1f8] sm:$0xff]  ;;  %v488_v10 = vpack.c.bf16 %v449_v3, %v448_v2  ;;  %s2277_s16 = sshra.s32 %s1662_s13, 4  ;;  %s2278_s16 = int_to_ptr.hbm [resolvable:$true] %s2277_s16 }
  0x83   : > { %770 = vperm.xlu1 %1939, %v387_v12   ;;  %s2279_s28 = scalar_lea.hbm %s2278_s16, 512  ;;  %p2284_p3 = scmp.lt.s32.totalorder %s2278_s16, %s2923_s7 }
  0x84   : > { %p2280_p0 = scmp.ne.s32.totalorder %s2278_s16, %s2279_s28 }
  0x86   : > { %p2281_p1 = pnand %p2280_p0, %p2420_p5 }
  0x88   : > { %p2282_p2 = pneg %p2281_p1 }
  0x8a   : > { %780 = vperm.xlu2 %1940, %v389_v14   ;;  %610 = vperm.xlu0 %1938, %v355_v15   ;;  %v2582_v14 = vld [vmem:[%s2920_s4] ss:$0 sm:$0xff] }
  0x8b   : > { %775 = vperm.xlu1 %1939, %v388_v16  }
  0x8c   : > { %981 = vmatmul.bf16.gmra.mxu0 %v469_v23 }
  0x8e   : > { %1061 = vmatmul.bf16.gmra.mxu2 %v485_v25  ;;  %v418_v25 = vld [vmem:[%s2483_s19 + $0x90] sm:$0xff] }
  0x8f   : > { %v473_v32 = vpack.c.bf16 %v419_v26, %v418_v25 }
  0x92   : > { %785 = vperm.xlu2 %1940, %v390_v21   ;;  %615 = vperm.xlu0 %1938, %v356_v22  }
  0x93   : > { %620 = vperm.xlu1 %1939, %v357_v24  }
  0x94   : > { %v676_v1 = vpop.permute.xlu0 %675 }
  0x95   : > { %v516_v61 = vpop.permute.xlu1 %515  ;;  %v868_v15 = vmul.f32 %v2570_v0, %v676_v1 }
  0x96   : > { %v836_v4 = vmul.f32 %v2570_v0, %v516_v61 }
  0x9a   : > { %630 = vperm.xlu2 %1940, %v359_v27   ;;  %790 = vperm.xlu0 %1938, %v391_v28   ;;  %v450_v27 = vld [vmem:[%s2483_s19 + $0x190] sm:$0xff]  ;;  %v451_v28 = vld [vmem:[%s2483_s19 + $0x198] sm:$0xff] }
  0x9b   : > { %625 = vperm.xlu1 %1939, %v358_v29   ;;  %v489_v35 = vpack.c.bf16 %v451_v28, %v450_v27  ;;  %v422_v27 = vld [vmem:[%s2483_s19 + $0xb0] sm:$0xff]  ;;  %v423_v28 = vld [vmem:[%s2483_s19 + $0xb8] sm:$0xff] }
  0x9c   : > { %986 = vmatmul.bf16.gmra.mxu0 %v470_v38  ;;  %v681_v16 = vpop.permute.xlu0 %680  ;;  %v691_v38 = vpop.permute.xlu2 %690 }
  0x9d   : > { %v521_v12 = vpop.permute.xlu1 %520  ;;  %v869_v29 = vmul.f32 %v2570_v0, %v681_v16  ;;  %v871_v61 = vmul.f32 %v2570_v0, %v691_v38 }
  0x9e   : > { %1066 = vmatmul.bf16.gmra.mxu2 %v486_v40  ;;  %v837_v13 = vmul.f32 %v2570_v0, %v521_v12 }
  0xa2   : > { %635 = vperm.xlu2 %1940, %v360_v36   ;;  %795 = vperm.xlu0 %1938, %v392_v37  }
  0xa3   : > { %800 = vperm.xlu1 %1939, %v393_v39  }
  0xa4   : > { %v526_v37 = vpop.permute.xlu0 %525 }
  0xa5   : > { %v838_v39 = vmul.f32 %v2570_v0, %v526_v37 }
  0xaa   : > { %810 = vperm.xlu2 %1940, %v395_v43   ;;  %640 = vperm.xlu0 %1938, %v361_v44   ;;  %v531_v44 = vpop.permute.xlu1 %530 }
  0xab   : > { %805 = vperm.xlu1 %1939, %v394_v45   ;;  %v870_v45 = vmul.f32 %v2570_v0, %v686_v20  ;;  %v839_v46 = vmul.f32 %v2570_v0, %v531_v44 }
  0xac   : > { %991 = vmatmul.bf16.gmra.mxu0 %v471_v54 }
  0xae   : > { %1071 = vmatmul.bf16.gmra.mxu2 %v487_v56  ;;  %v696_v56 = vpop.permute.xlu2 %695 }
  0xaf   : > { %v872_v20 = vmul.f32 %v2570_v0, %v696_v56 }
  0xb2   : > { %815 = vperm.xlu2 %1940, %v396_v52   ;;  %645 = vperm.xlu0 %1938, %v362_v53  }
  0xb3   : > { %650 = vperm.xlu1 %1939, %v363_v55  }
  0xb9   : > { %v957_v8 = vpop.f32.mrf.mxu0 }
  0xba   : > { %660 = vperm.xlu2 %1940, %v365_v58   ;;  %820 = vperm.xlu0 %1938, %v397_v59   ;;  %v958_v11 = vadd.f32 %v957_v8, %v836_v4  ;;  %v421_v58 = vld [vmem:[%s2483_s19 + $0xa8] sm:$0xff]  ;;  %v452_v59 = vld [vmem:[%s2483_s19 + $0x1a0] sm:$0xff] }
  0xbb   : > { %655 = vperm.xlu1 %1939, %v364_v60   ;;  %v453_v60 = vld [vmem:[%s2483_s19 + $0x1a8] sm:$0xff]  ;;  %v474_v1 = vpack.c.bf16 %v421_v58, %v420_v57 }
  0xbc   : > { %996 = vmatmul.bf16.gmra.mxu0 %v472_v7  ;;  %v1121_v17 = vadd.f32 %v2582_v14, %v958_v11  ;;  %v490_v4 = vpack.c.bf16 %v453_v60, %v452_v59  ;;  %v424_v59 = vld [vmem:[%s2483_s19 + $0xc0] sm:$0xff]  ;;  %v425_v60 = vld [vmem:[%s2483_s19 + $0xc8] sm:$0xff] }
  0xbe   : > { %1076 = vmatmul.bf16.gmra.mxu2 %v488_v10  ;;  %1944 = vtanh.f32 %v1121_v17 }
  0xc1   : > { %v1037_v18 = vpop.f32.mrf.mxu2  ;;  %v959_v21 = vpop.f32.mrf.mxu0 }
  0xc2   : > { %665 = vperm.xlu2 %1940, %v366_v5   ;;  %825 = vperm.xlu0 %1938, %v398_v6   ;;  %v960_v22 = vadd.f32 %v959_v21, %v837_v13  ;;  %v1038_v23 = vadd.f32 %v1037_v18, %v868_v15  ;;  %v701_v5 = vpop.permute.xlu0 %700  ;;  %v536_v6 = vpop.permute.xlu1 %535 }
  0xc3   : > { %830 = vperm.xlu1 %1939, %v399_v9   ;;  %v840_v8 = vmul.f32 %v2570_v0, %v536_v6  ;;  %v541_v13 = vpop.permute.xlu2 %540 }
  0xc4   : > { %v1122_v24 = vadd.f32 %v2582_v14, %v960_v22  ;;  %v1153_v30 = vadd.f32 %v2582_v14, %v1038_v23  ;;  %v1945_v36 = vpop.eup %1944  ;;  %v841_v15 = vmul.f32 %v2570_v0, %v541_v13 }
  0xc6   : > { %1946 = vtanh.f32 %v1122_v24 }
  0xc7   : > { %1948 = vtanh.f32 %v1153_v30  ;;  %v455_v30 = vld [vmem:[%s2483_s19 + $0x1b8] sm:$0xff] }
  0xc9   : > { %v1039_v31 = vpop.f32.mrf.mxu2  ;;  %v962_v34 = vpop.f32.mrf.mxu0 }
  0xca   : > { %670 = vperm.xlu0 %1938, %v367_v19   ;;  %v1040_v33 = vadd.f32 %v1039_v31, %v869_v29  ;;  %v963_v42 = vadd.f32 %v962_v34, %v838_v39  ;;  %v706_v23 = vpop.permute.xlu0 %705  ;;  %v454_v29 = vld [vmem:[%s2483_s19 + $0x1b0] sm:$0xff]  ;;  %v873_v31 = vmul.f32 %v2570_v0, %v701_v5  ;;  %v475_v34 = vpack.c.bf16 %v423_v28, %v422_v27  ;;  %v711_v39 = vpop.permute.xlu1 %710 }
  0xcb   : > { %v491_v37 = vpack.c.bf16 %v455_v30, %v454_v29  ;;  %v546_v38 = vpop.permute.xlu2 %545  ;;  %v426_v29 = vld [vmem:[%s2483_s19 + $0xd0] sm:$0xff]  ;;  %v427_v30 = vld [vmem:[%s2483_s19 + $0xd8] sm:$0xff] }
  0xcc   : > { %v1154_v40 = vadd.f32 %v2582_v14, %v1040_v33  ;;  %v1947_v41 = vpop.eup %1946  ;;  %1001 = vmatmul.bf16.gmra.mxu0 %v473_v32  ;;  %v1123_v48 = vadd.f32 %v2582_v14, %v963_v42 }
  0xcd   : > { %v1249_v43 = vpack.c.bf16 %v1947_v41, %v1945_v36  ;;  %v1949_v50 = vpop.eup %1948  ;;  %v842_v41 = vmul.f32 %v2570_v0, %v546_v38 }
  0xce   : > { %1950 = vtanh.f32 %v1154_v40  ;;  %1081 = vmatmul.bf16.gmra.mxu2 %v489_v35 }
  0xcf   : > { %1357 = vmatmul.bf16.vlgmr.msra.gmra.mxu1 %v1249_v43  ;;  %1952 = vtanh.f32 %v1123_v48 }
  0xd1   : > { %v1042_v47 = vpop.f32.mrf.mxu2  ;;  %v964_v49 = vpop.f32.mrf.mxu0 }
  0xd2   : > { %v965_v51 = vadd.f32 %v964_v49, %v839_v46  ;;  %v1043_v53 = vadd.f32 %v1042_v47, %v870_v45  ;;  %v551_v46 = vpop.permute.xlu0 %550 }
  0xd3   : > { %v843_v47 = vmul.f32 %v2570_v0, %v551_v46 }
  0xd4   : > { %v1951_v52 = vpop.eup %1950  ;;  %v1124_v54 = vadd.f32 %v2582_v14, %v965_v51  ;;  %v1155_v62 = vadd.f32 %v2582_v14, %v1043_v53 }
  0xd5   : > { %v1265_v55 = vpack.c.bf16 %v1951_v52, %v1949_v50  ;;  %v1953_v7 = vpop.eup %1952  ;;  %v874_v52 = vmul.f32 %v2570_v0, %v706_v23 }
  0xd6   : > { %1954 = vtanh.f32 %v1124_v54 }
  0xd7   : > { %1437 = vmatmul.bf16.vlgmr.msra.gmra.mxu3 %v1265_v55  ;;  %1956 = vtanh.f32 %v1155_v62  ;;  %v716_v55 = vpop.permute.xlu1 %715  ;;  %v457_v62 = vld [vmem:[%s2483_s19 + $0x1c8] sm:$0xff] }
  0xd9   : > { %v1044_v63 = vpop.f32.mrf.mxu2  ;;  %v967_v3 = vpop.f32.mrf.mxu0 }
  0xda   : > { %v1045_v2 = vadd.f32 %v1044_v63, %v871_v61  ;;  %v968_v11 = vadd.f32 %v967_v3, %v840_v8  ;;  %v456_v61 = vld [vmem:[%s2483_s19 + $0x1c0] sm:$0xff]  ;;  %v875_v63 = vmul.f32 %v2570_v0, %v711_v39 }
  0xdc   : > { %v1156_v9 = vadd.f32 %v2582_v14, %v1045_v2  ;;  %v1955_v10 = vpop.eup %1954  ;;  %1006 = vmatmul.bf16.gmra.mxu0 %v474_v1  ;;  %v1125_v17 = vadd.f32 %v2582_v14, %v968_v11  ;;  %v556_v1 = vpop.permute.xlu0 %555 }
  0xdd   : > { %v1250_v12 = vpack.c.bf16 %v1955_v10, %v1953_v7  ;;  %v1957_v19 = vpop.eup %1956  ;;  %v492_v7 = vpack.c.bf16 %v457_v62, %v456_v61  ;;  %v844_v10 = vmul.f32 %v2570_v0, %v556_v1  ;;  %v428_v61 = vld [vmem:[%s2483_s19 + $0xe0] sm:$0xff]  ;;  %v429_v62 = vld [vmem:[%s2483_s19 + $0xe8] sm:$0xff] }
  0xde   : > { %1958 = vtanh.f32 %v1156_v9  ;;  %1086 = vmatmul.bf16.gmra.mxu2 %v490_v4  ;;  %v476_v4 = vpack.c.bf16 %v425_v60, %v424_v59  ;;  %v721_v9 = vpop.permute.xlu2 %720  ;;  %v461_v1 = vld [vmem:[%s2483_s19 + $0x1e8] sm:$0xff] }
  0xdf   : > { %1362 = vmatmul.bf16.gmra.mxu1 %v1250_v12  ;;  %1960 = vtanh.f32 %v1125_v17 }
  0xe1   : > { %v1047_v16 = vpop.f32.mrf.mxu2  ;;  %v969_v18 = vpop.f32.mrf.mxu0 }
  0xe2   : > { %v970_v21 = vadd.f32 %v969_v18, %v841_v15  ;;  %v1048_v24 = vadd.f32 %v1047_v16, %v872_v20  ;;  %v561_v16 = vpop.permute.xlu1 %560 }
  0xe3   : > { %v845_v17 = vmul.f32 %v2570_v0, %v561_v16 }
  0xe4   : > { %v1959_v22 = vpop.eup %1958  ;;  %v1126_v25 = vadd.f32 %v2582_v14, %v970_v21  ;;  %v1157_v32 = vadd.f32 %v2582_v14, %v1048_v24  ;;  %v731_v38 = vpop.permute.xlu0 %730 }
  0xe5   : > { %v1266_v26 = vpack.c.bf16 %v1959_v22, %v1957_v19  ;;  %v1961_v40 = vpop.eup %1960  ;;  %v876_v22 = vmul.f32 %v2570_v0, %v716_v55 }
  0xe6   : > { %1962 = vtanh.f32 %v1126_v25  ;;  %v726_v28 = vpop.permute.xlu2 %725 }
  0xe7   : > { %1442 = vmatmul.bf16.gmra.mxu3 %v1266_v26  ;;  %1964 = vtanh.f32 %v1157_v32  ;;  %v459_v32 = vld [vmem:[%s2483_s19 + $0x1d8] sm:$0xff] }
  0xe9   : > { %v1049_v33 = vpop.f32.mrf.mxu2  ;;  %v972_v36 = vpop.f32.mrf.mxu0 }
  0xea   : > { %v1050_v35 = vadd.f32 %v1049_v33, %v873_v31  ;;  %v973_v44 = vadd.f32 %v972_v36, %v842_v41  ;;  %v458_v31 = vld [vmem:[%s2483_s19 + $0x1d0] sm:$0xff]  ;;  %v877_v33 = vmul.f32 %v2570_v0, %v721_v9 }
  0xeb   : > { %v493_v41 = vpack.c.bf16 %v459_v32, %v458_v31  ;;  %v430_v31 = vld [vmem:[%s2483_s19 + $0xf0] sm:$0xff]  ;;  %v431_v32 = vld [vmem:[%s2483_s19 + $0xf8] sm:$0xff] }
  0xec   : > { %v1158_v42 = vadd.f32 %v2582_v14, %v1050_v35  ;;  %v1963_v43 = vpop.eup %1962  ;;  %1011 = vmatmul.bf16.gmra.mxu0 %v475_v34  ;;  %v1127_v49 = vadd.f32 %v2582_v14, %v973_v44  ;;  %v566_v34 = vpop.permute.xlu1 %565 }
  0xed   : > { %v1251_v45 = vpack.c.bf16 %v1963_v43, %v1961_v40  ;;  %v1965_v51 = vpop.eup %1964  ;;  %v846_v43 = vmul.f32 %v2570_v0, %v566_v34  ;;  %v463_v34 = vld [vmem:[%s2483_s19 + $0x1f8] sm:$0xff] }
  0xee   : > { %1966 = vtanh.f32 %v1158_v42  ;;  %1091 = vmatmul.bf16.gmra.mxu2 %v491_v37  ;;  %v477_v37 = vpack.c.bf16 %v427_v30, %v426_v29 }
  0xef   : > { %1367 = vmatmul.bf16.gmra.mxu1 %v1251_v45  ;;  %1968 = vtanh.f32 %v1127_v49 }
  0xf1   : > { %v1052_v48 = vpop.f32.mrf.mxu2  ;;  %v974_v50 = vpop.f32.mrf.mxu0 }
  0xf2   : > { %v975_v53 = vadd.f32 %v974_v50, %v843_v47  ;;  %v1053_v56 = vadd.f32 %v1052_v48, %v874_v52  ;;  %v571_v48 = vpop.permute.xlu2 %570 }
  0xf3   : > { %v847_v49 = vmul.f32 %v2570_v0, %v571_v48 }
  0xf4   : > { %v1967_v54 = vpop.eup %1966  ;;  %v1128_v57 = vadd.f32 %v2582_v14, %v975_v53  ;;  %v1159_v2 = vadd.f32 %v2582_v14, %v1053_v56 }
  0xf5   : > { %v1267_v58 = vpack.c.bf16 %v1967_v54, %v1965_v51  ;;  %v1969_v8 = vpop.eup %1968  ;;  %v878_v54 = vmul.f32 %v2570_v0, %v726_v28 }
  0xf6   : > { %1970 = vtanh.f32 %v1128_v57  ;;  %v736_v57 = vpop.permute.xlu0 %735 }
  0xf7   : > { %1447 = vmatmul.bf16.gmra.mxu3 %v1267_v58  ;;  %1972 = vtanh.f32 %v1159_v2  ;;  %v879_v2 = vmul.f32 %v2570_v0, %v731_v38 }
  0xf9   : > { %v1054_v3 = vpop.f32.mrf.mxu2  ;;  %v977_v6 = vpop.f32.mrf.mxu0 }
  0xfa   : > { %v1055_v5 = vadd.f32 %v1054_v3, %v875_v63  ;;  %v978_v13 = vadd.f32 %v977_v6, %v844_v10  ;;  %v460_v63 = vld [vmem:[%s2483_s19 + $0x1e0] sm:$0xff]  ;;  %v741_v6 = vpop.permute.xlu1 %740  ;;  %v576_v10 = vpop.permute.xlu2 %575 }
  0xfb   : > { %v494_v9 = vpack.c.bf16 %v461_v1, %v460_v63 }
  0xfc   : > { %v1160_v11 = vadd.f32 %v2582_v14, %v1055_v5  ;;  %v1971_v12 = vpop.eup %1970  ;;  %1016 = vmatmul.bf16.gmra.mxu0 %v476_v4  ;;  %v1129_v19 = vadd.f32 %v2582_v14, %v978_v13  ;;  %v478_v5 = vpack.c.bf16 %v429_v62, %v428_v61 }
  0xfd   : > { %v1252_v15 = vpack.c.bf16 %v1971_v12, %v1969_v8  ;;  %v1973_v21 = vpop.eup %1972  ;;  %v848_v12 = vmul.f32 %v2570_v0, %v576_v10 }
  0xfe   : > { %1974 = vtanh.f32 %v1160_v11  ;;  %1096 = vmatmul.bf16.gmra.mxu2 %v492_v7  ;;  %v581_v16 = vpop.permute.xlu0 %580 }
  0xff   : > { %1372 = vmatmul.bf16.gmra.mxu1 %v1252_v15  ;;  %1976 = vtanh.f32 %v1129_v19  ;;  %v849_v19 = vmul.f32 %v2570_v0, %v581_v16 }
 0x101   : > { %v1057_v18 = vpop.f32.mrf.mxu2  ;;  %v979_v20 = vpop.f32.mrf.mxu0 }
 0x102   : > { %v980_v23 = vadd.f32 %v979_v20, %v845_v17  ;;  %v1058_v25 = vadd.f32 %v1057_v18, %v876_v22 }
 0x104   : > { %v1975_v24 = vpop.eup %1974  ;;  %v1130_v26 = vadd.f32 %v2582_v14, %v980_v23  ;;  %v1161_v35 = vadd.f32 %v2582_v14, %v1058_v25 }
 0x105   : > { %v1268_v27 = vpack.c.bf16 %v1975_v24, %v1973_v21  ;;  %v1977_v42 = vpop.eup %1976  ;;  %v880_v24 = vmul.f32 %v2570_v0, %v736_v57 }
 0x106   : > { %1978 = vtanh.f32 %v1130_v26 }
 0x107   : > { %1452 = vmatmul.bf16.gmra.mxu3 %v1268_v27  ;;  %1980 = vtanh.f32 %v1161_v35  ;;  %v746_v27 = vpop.permute.xlu1 %745  ;;  %v881_v35 = vmul.f32 %v2570_v0, %v741_v6 }
 0x109   : > { %v1059_v36 = vpop.f32.mrf.mxu2  ;;  %v982_v40 = vpop.f32.mrf.mxu0 }
 0x10a   : > { %v1060_v39 = vadd.f32 %v1059_v36, %v877_v33  ;;  %v983_v46 = vadd.f32 %v982_v40, %v846_v43  ;;  %v462_v33 = vld [vmem:[%s2483_s19 + $0x1f0] sm:$0xff]  ;;  %v586_v36 = vpop.permute.xlu0 %585  ;;  %v751_v40 = vpop.permute.xlu2 %750  ;;  %s2283_s19 = scalar_lea.hbm %s2923_s7, 2048 }
 0x10b   : > { %v495_v43 = vpack.c.bf16 %v463_v34, %v462_v33  ;;  %v883_v63 = vmul.f32 %v2570_v0, %v751_v40  ;;  %v2685_v34 = vld [vmem:[%s2922_s6] ss:$0 sm:$0xff]  ;;  %p2285_p4 = scmp.lt.s32.totalorder %s2283_s19, %s2279_s28 }
 0x10c   : > { %v1162_v44 = vadd.f32 %v2582_v14, %v1060_v39  ;;  %v1979_v45 = vpop.eup %1978  ;;  %1021 = vmatmul.bf16.gmra.mxu0 %v477_v37  ;;  %v1131_v51 = vadd.f32 %v2582_v14, %v983_v46  ;;  %v479_v39 = vpack.c.bf16 %v431_v32, %v430_v31 }
 0x10d   : > { %v1253_v47 = vpack.c.bf16 %v1979_v45, %v1977_v42  ;;  %v1981_v53 = vpop.eup %1980  ;;  %v850_v45 = vmul.f32 %v2570_v0, %v586_v36  ;;  %p2286_p7 = por %p2285_p4, %p2284_p3 }
 0x10e   : > { %1982 = vtanh.f32 %v1162_v44  ;;  %1101 = vmatmul.bf16.gmra.mxu2 %v493_v41 }
 0x10f   : > { %1377 = vmatmul.bf16.gmra.mxu1 %v1253_v47  ;;  %1984 = vtanh.f32 %v1131_v51  ;;  %v591_v48 = vpop.permute.xlu1 %590  ;;  %p2287_p8 = pnand %p2286_p7, %p2282_p2 }
 0x110   : > { %v851_v51 = vmul.f32 %v2570_v0, %v591_v48 }
 0x111   : > { %v1062_v50 = vpop.f32.mrf.mxu2  ;;  %v984_v52 = vpop.f32.mrf.mxu0 }
 0x112   : > { %v985_v55 = vadd.f32 %v984_v52, %v847_v49  ;;  %v1063_v58 = vadd.f32 %v1062_v50, %v878_v54 }
 0x114   : > { %v1983_v56 = vpop.eup %1982  ;;  %v1132_v59 = vadd.f32 %v2582_v14, %v985_v55  ;;  %v1163_v3 = vadd.f32 %v2582_v14, %v1063_v58 }
 0x115   : > { %v1269_v60 = vpack.c.bf16 %v1983_v56, %v1981_v53  ;;  %v1985_v11 = vpop.eup %1984  ;;  %v882_v56 = vmul.f32 %v2570_v0, %v746_v27 }
 0x116   : > { %1986 = vtanh.f32 %v1132_v59  ;;  %v756_v59 = vpop.permute.xlu2 %755 }
 0x117   : > { %1457 = vmatmul.bf16.gmra.mxu3 %v1269_v60  ;;  %1988 = vtanh.f32 %v1163_v3  ;;  %v596_v1 = vpop.permute.xlu1 %595 }
 0x119   : > { %v1064_v4 = vpop.f32.mrf.mxu2  ;;  %v987_v8 = vpop.f32.mrf.mxu0 }
 0x11a   : > { %v1065_v7 = vadd.f32 %v1064_v4, %v879_v2  ;;  %v988_v17 = vadd.f32 %v987_v8, %v848_v12  ;;  %v761_v4 = vpop.permute.xlu0 %760  ;;  %v852_v8 = vmul.f32 %v2570_v0, %v596_v1 }
 0x11b   : > { %v885_v27 = vmul.f32 %v2570_v0, %v761_v4 }
 0x11c   : > { %v1164_v13 = vadd.f32 %v2582_v14, %v1065_v7  ;;  %v1987_v15 = vpop.eup %1986  ;;  %1026 = vmatmul.bf16.gmra.mxu0 %v478_v5  ;;  %v1133_v21 = vadd.f32 %v2582_v14, %v988_v17 }
 0x11d   : > { %v1254_v18 = vpack.c.bf16 %v1987_v15, %v1985_v11  ;;  %v1989_v23 = vpop.eup %1988 }
 0x11e   : > { %1990 = vtanh.f32 %v1164_v13  ;;  %1106 = vmatmul.bf16.gmra.mxu2 %v494_v9  ;;  %v601_v11 = vpop.permute.xlu2 %600 }
 0x11f   : > { %1382 = vmatmul.bf16.gmra.mxu1 %v1254_v18  ;;  %1992 = vtanh.f32 %v1133_v21  ;;  %v853_v15 = vmul.f32 %v2570_v0, %v601_v11  ;;  %v771_v31 = vpop.permute.xlu1 %770 }
 0x121   : > { %v1067_v20 = vpop.f32.mrf.mxu2  ;;  %v989_v22 = vpop.f32.mrf.mxu0 }
 0x122   : > { %v990_v25 = vadd.f32 %v989_v22, %v849_v19  ;;  %v1068_v28 = vadd.f32 %v1067_v20, %v880_v24  ;;  %v884_v20 = vmul.f32 %v2570_v0, %v756_v59 }
 0x124   : > { %v1991_v26 = vpop.eup %1990  ;;  %v1134_v29 = vadd.f32 %v2582_v14, %v990_v25  ;;  %v1165_v37 = vadd.f32 %v2582_v14, %v1068_v28 }
 0x125   : > { %v1270_v30 = vpack.c.bf16 %v1991_v26, %v1989_v23  ;;  %v1993_v44 = vpop.eup %1992  ;;  %v766_v23 = vpop.permute.xlu0 %765 }
 0x126   : > { %1994 = vtanh.f32 %v1134_v29  ;;  %v606_v28 = vpop.permute.xlu2 %605 }
 0x127   : > { %1462 = vmatmul.bf16.gmra.mxu3 %v1270_v30  ;;  %1996 = vtanh.f32 %v1165_v37  ;;  %v854_v36 = vmul.f32 %v2570_v0, %v606_v28 }
 0x129   : > { %v1069_v38 = vpop.f32.mrf.mxu2  ;;  %v992_v42 = vpop.f32.mrf.mxu0 }
 0x12a   : > { %v1070_v41 = vadd.f32 %v1069_v38, %v881_v35  ;;  %v993_v49 = vadd.f32 %v992_v42, %v850_v45 }
 0x12c   : > { %v1166_v46 = vadd.f32 %v2582_v14, %v1070_v41  ;;  %v1995_v47 = vpop.eup %1994  ;;  %1031 = vmatmul.bf16.gmra.mxu0 %v479_v39  ;;  %v1135_v53 = vadd.f32 %v2582_v14, %v993_v49 }
 0x12d   : > { %v1255_v50 = vpack.c.bf16 %v1995_v47, %v1993_v44  ;;  %v1997_v55 = vpop.eup %1996  ;;  %v611_v40 = vpop.permute.xlu0 %610 }
 0x12e   : > { %1998 = vtanh.f32 %v1166_v46  ;;  %1111 = vmatmul.bf16.gmra.mxu2 %v495_v43  ;;  %v855_v44 = vmul.f32 %v2570_v0, %v611_v40  ;;  %v886_v46 = vmul.f32 %v2570_v0, %v766_v23  ;;  %v781_v59 = vpop.permute.xlu2 %780 }
 0x12f   : > { %1387 = vmatmul.bf16.gmra.mxu1 %v1255_v50  ;;  %2000 = vtanh.f32 %v1135_v53 }
 0x131   : > { %v1072_v52 = vpop.f32.mrf.mxu2  ;;  %v994_v54 = vpop.f32.mrf.mxu0 }
 0x132   : > { %v995_v57 = vadd.f32 %v994_v54, %v851_v51  ;;  %v1073_v60 = vadd.f32 %v1072_v52, %v882_v56  ;;  %v776_v52 = vpop.permute.xlu1 %775 }
 0x134   : > { %v1999_v58 = vpop.eup %1998  ;;  %v1136_v61 = vadd.f32 %v2582_v14, %v995_v57  ;;  %v1167_v2 = vadd.f32 %v2582_v14, %v1073_v60  ;;  %v887_v60 = vmul.f32 %v2570_v0, %v771_v31 }
 0x135   : > { %v1271_v62 = vpack.c.bf16 %v1999_v58, %v1997_v55  ;;  %v2001_v7 = vpop.eup %2000 }
 0x136   : > { %2002 = vtanh.f32 %v1136_v61 }
 0x137   : > { %1467 = vmatmul.bf16.gmra.mxu3 %v1271_v62  ;;  %2004 = vtanh.f32 %v1167_v2  ;;  %v616_v62 = vpop.permute.xlu0 %615 }
 0x139   : > { %v1074_v3 = vpop.f32.mrf.mxu2  ;;  %v997_v6 = vpop.f32.mrf.mxu0 }
 0x13a   : > { %v1075_v5 = vadd.f32 %v1074_v3, %v883_v63  ;;  %v998_v12 = vadd.f32 %v997_v6, %v852_v8  ;;  %v856_v6 = vmul.f32 %v2570_v0, %v616_v62  ;;  %v621_v11 = vpop.permute.xlu1 %620 }
 0x13c   : > { %v1168_v9 = vadd.f32 %v2582_v14, %v1075_v5  ;;  %v2003_v10 = vpop.eup %2002  ;;  %v1137_v17 = vadd.f32 %v2582_v14, %v998_v12 }
 0x13d   : > { %v1256_v13 = vpack.c.bf16 %v2003_v10, %v2001_v7  ;;  %v2005_v19 = vpop.eup %2004 }
 0x13e   : > { %2006 = vtanh.f32 %v1168_v9 }
 0x13f   : > { %1392 = vmatmul.bf16.gmra.mxu1 %v1256_v13  ;;  %2008 = vtanh.f32 %v1137_v17 }
 0x141   : > { %v1077_v16 = vpop.f32.mrf.mxu2  ;;  %v999_v18 = vpop.f32.mrf.mxu0 }
 0x142   : > { %v1000_v21 = vadd.f32 %v999_v18, %v853_v15  ;;  %v1078_v24 = vadd.f32 %v1077_v16, %v884_v20  ;;  %v857_v16 = vmul.f32 %v2570_v0, %v621_v11 }
 0x144   : > { %v2007_v22 = vpop.eup %2006  ;;  %v1138_v25 = vadd.f32 %v2582_v14, %v1000_v21  ;;  %v1169_v29 = vadd.f32 %v2582_v14, %v1078_v24 }
 0x145   : > { %v1272_v26 = vpack.c.bf16 %v2007_v22, %v2005_v19  ;;  %v2009_v35 = vpop.eup %2008  ;;  %v888_v19 = vmul.f32 %v2570_v0, %v776_v52 }
 0x146   : > { %2010 = vtanh.f32 %v1138_v25 }
 0x147   : > { %1472 = vmatmul.bf16.gmra.mxu3 %v1272_v26  ;;  %2012 = vtanh.f32 %v1169_v29 }
 0x149   : > { %v1079_v30 = vpop.f32.mrf.mxu2  ;;  %v1002_v33 = vpop.f32.mrf.mxu0 }
 0x14a   : > { %v1080_v32 = vadd.f32 %v1079_v30, %v885_v27  ;;  %v1003_v41 = vadd.f32 %v1002_v33, %v854_v36  ;;  %v786_v27 = vpop.permute.xlu2 %785  ;;  %v791_v36 = vpop.permute.xlu0 %790 }
 0x14b   : > { %v891_v11 = vmul.f32 %v2570_v0, %v791_v36 }
 0x14c   : > { %v1170_v37 = vadd.f32 %v2582_v14, %v1080_v32  ;;  %v2011_v38 = vpop.eup %2010  ;;  %v1358_v39 = vpop.f32.mrf.mxu1  ;;  %v1139_v47 = vadd.f32 %v2582_v14, %v1003_v41 }
 0x14d   : > { %v1359_v42 = vadd.f32 %v2685_v34, %v1358_v39  ;;  %v1257_v43 = vpack.c.bf16 %v2011_v38, %v2009_v35  ;;  %v2013_v49 = vpop.eup %2012  ;;  %v889_v35 = vmul.f32 %v2570_v0, %v781_v59  ;;  %v626_v38 = vpop.permute.xlu1 %625 }
 0x14e   : > { %2014 = vtanh.f32 %v1170_v37 }
 0x14f   : > { %2016 = vtanh.f32 %v1359_v42  ;;  %1397 = vmatmul.bf16.gmra.mxu1 %v1257_v43 }
 0x150   : > { %2018 = vtanh.f32 %v1139_v47 }
 0x151   : > { %v1082_v45 = vpop.f32.mrf.mxu2  ;;  %v1004_v48 = vpop.f32.mrf.mxu0 }
 0x152   : > { %v1005_v50 = vadd.f32 %v1004_v48, %v855_v44  ;;  %v1083_v53 = vadd.f32 %v1082_v45, %v886_v46  ;;  %v858_v46 = vmul.f32 %v2570_v0, %v626_v38 }
 0x154   : > { %v2015_v51 = vpop.eup %2014  ;;  %v1140_v54 = vadd.f32 %v2582_v14, %v1005_v50  ;;  %v1360_v55 = vpop.f32.mrf.mxu1  ;;  %v1171_v61 = vadd.f32 %v2582_v14, %v1083_v53 }
 0x155   : > { %v1273_v56 = vpack.c.bf16 %v2015_v51, %v2013_v49  ;;  %v2017_v57 = vpop.eup %2016  ;;  %v1361_v58 = vadd.f32 %v2685_v34, %v1360_v55  ;;  %v631_v51 = vpop.permute.xlu2 %630 }
 0x156   : > { %1582 = vst [vmem:[%s2698_s14] sm:$0xff] %v2017_v57  ;;  %2020 = vtanh.f32 %v1140_v54  ;;  %v2019_v5 = vpop.eup %2018  ;;  %v859_v55 = vmul.f32 %v2570_v0, %v631_v51 }
 0x157   : > { %1477 = vmatmul.bf16.gmra.mxu3 %v1273_v56  ;;  %2022 = vtanh.f32 %v1361_v58  ;;  %v890_v58 = vmul.f32 %v2570_v0, %v786_v27 }
 0x158   : > { %2024 = vtanh.f32 %v1171_v61 }
 0x159   : > { %v1084_v63 = vpop.f32.mrf.mxu2  ;;  %v1007_v3 = vpop.f32.mrf.mxu0 }
 0x15a   : > { %v1085_v1 = vadd.f32 %v1084_v63, %v887_v60  ;;  %v1438_v2 = vpop.f32.mrf.mxu3  ;;  %v1008_v12 = vadd.f32 %v1007_v3, %v856_v6  ;;  %v796_v3 = vpop.permute.xlu0 %795 }
 0x15b   : > { %v1439_v4 = vadd.f32 %v2685_v34, %v1438_v2 }
 0x15c   : > { %v1172_v7 = vadd.f32 %v2582_v14, %v1085_v1  ;;  %v2021_v8 = vpop.eup %2020  ;;  %v1363_v9 = vpop.f32.mrf.mxu1  ;;  %v1141_v20 = vadd.f32 %v2582_v14, %v1008_v12 }
 0x15d   : > { %2026 = vtanh.f32 %v1439_v4  ;;  %v2023_v10 = vpop.eup %2022  ;;  %v1364_v13 = vadd.f32 %v2685_v34, %v1363_v9  ;;  %v1258_v15 = vpack.c.bf16 %v2021_v8, %v2019_v5 }
 0x15e   : > { %2028 = vtanh.f32 %v1172_v7  ;;  %1583 = vst [vmem:[%s2698_s14 + $0x8] sm:$0xff] %v2023_v10  ;;  %v2025_v18 = vpop.eup %2024  ;;  %v636_v10 = vpop.permute.xlu2 %635 }
 0x15f   : > { %2030 = vtanh.f32 %v1364_v13  ;;  %1402 = vmatmul.bf16.gmra.mxu1 %v1258_v15  ;;  %v801_v13 = vpop.permute.xlu1 %800 }
 0x161   : > { %v1087_v17 = vpop.f32.mrf.mxu2  ;;  %v1009_v22 = vpop.f32.mrf.mxu0 }
 0x162   : > { %v1440_v21 = vpop.f32.mrf.mxu3  ;;  %v1010_v25 = vadd.f32 %v1009_v22, %v857_v16  ;;  %v1088_v28 = vadd.f32 %v1087_v17, %v888_v19  ;;  %v860_v22 = vmul.f32 %v2570_v0, %v636_v10  ;;  %v641_v27 = vpop.permute.xlu0 %640  ;;  %v2743_v0 = vld [vmem:[%s2919_s3] ss:$0 sm:$0xff] }
 0x163   : > { %v2027_v23 = vpop.eup %2026  ;;  %v1441_v24 = vadd.f32 %v2685_v34, %v1440_v21  ;;  %v893_v51 = vmul.f32 %v2743_v0, %v801_v13 }
 0x164   : > { %v2029_v26 = vpop.eup %2028  ;;  %1614 = vst [vmem:[%s2698_s14 + $0x100] sm:$0xff] %v2027_v23  ;;  %v1142_v29 = vadd.f32 %v2582_v14, %v1010_v25  ;;  %v1365_v30 = vpop.f32.mrf.mxu1  ;;  %v1173_v37 = vadd.f32 %v2582_v14, %v1088_v28 }
 0x165   : > { %2032 = vtanh.f32 %v1441_v24  ;;  %v1274_v31 = vpack.c.bf16 %v2029_v26, %v2025_v18  ;;  %v2031_v32 = vpop.eup %2030  ;;  %v1366_v33 = vadd.f32 %v2685_v34, %v1365_v30 }
 0x166   : > { %2034 = vtanh.f32 %v1141_v20  ;;  %1584 = vst [vmem:[%s2698_s14 + $0x10] sm:$0xff] %v2031_v32 }
 0x167   : > { %2036 = vtanh.f32 %v1142_v29  ;;  %1482 = vmatmul.bf16.gmra.mxu3 %v1274_v31  ;;  %v861_v31 = vmul.f32 %v2743_v0, %v641_v27 }
 0x168   : > { %2038 = vtanh.f32 %v1366_v33 }
 0x169   : > { %v1089_v39 = vpop.f32.mrf.mxu2  ;;  %v1012_v42 = vpop.f32.mrf.mxu0  ;;  %2040 = vtanh.f32 %v1173_v37 }
 0x16a   : > { %v1090_v40 = vadd.f32 %v1089_v39, %v889_v35  ;;  %v1443_v41 = vpop.f32.mrf.mxu3  ;;  %v1013_v52 = vadd.f32 %v1012_v42, %v858_v46  ;;  %v892_v35 = vmul.f32 %v2743_v0, %v796_v3 }
 0x16b   : > { %v2033_v43 = vpop.eup %2032  ;;  %v1444_v44 = vadd.f32 %v2685_v34, %v1443_v41 }
 0x16c   : > { %v2035_v45 = vpop.eup %2034  ;;  %1615 = vst [vmem:[%s2698_s14 + $0x108] sm:$0xff] %v2033_v43  ;;  %v1174_v47 = vadd.f32 %v2582_v14, %v1090_v40  ;;  %v1368_v49 = vpop.f32.mrf.mxu1  ;;  %v1143_v59 = vadd.f32 %v2582_v14, %v1013_v52 }
 0x16d   : > { %v2037_v48 = vpop.eup %2036  ;;  %2042 = vtanh.f32 %v1444_v44  ;;  %v1369_v53 = vadd.f32 %v2685_v34, %v1368_v49  ;;  %v806_v43 = vpop.permute.xlu1 %805 }
 0x16e   : > { %v2039_v50 = vpop.eup %2038  ;;  %2044 = vtanh.f32 %v1174_v47  ;;  %v1259_v54 = vpack.c.bf16 %v2037_v48, %v2035_v45  ;;  %v2753_v45 = vld [vmem:[%s2920_s4] ss:$0 sm:$0xff]  ;;  %v894_v10 = vmul.f32 %v2743_v0, %v806_v43 }
 0x16f   : > { %1585 = vst [vmem:[%s2698_s14 + $0x18] sm:$0xff] %v2039_v50  ;;  %2046 = vtanh.f32 %v1369_v53  ;;  %v2041_v57 = vpop.eup %2040  ;;  %v811_v50 = vpop.permute.xlu2 %810 }
 0x170   : > { %1407 = vmatmul.bf16.gmra.mxu1 %v1259_v54  ;;  %v646_v53 = vpop.permute.xlu0 %645 }
 0x171   : > { %v1092_v56 = vpop.f32.mrf.mxu2  ;;  %v1014_v61 = vpop.f32.mrf.mxu0 }
 0x172   : > { %v1445_v60 = vpop.f32.mrf.mxu3  ;;  %v1015_v1 = vadd.f32 %v1014_v61, %v859_v55  ;;  %v1093_v4 = vadd.f32 %v1092_v56, %v890_v58  ;;  %v862_v61 = vmul.f32 %v2743_v0, %v646_v53 }
 0x173   : > { %v2043_v62 = vpop.eup %2042  ;;  %v1446_v63 = vadd.f32 %v2685_v34, %v1445_v60 }
 0x174   : > { %v2045_v2 = vpop.eup %2044  ;;  %1616 = vst [vmem:[%s2698_s14 + $0x110] sm:$0xff] %v2043_v62  ;;  %v1144_v5 = vadd.f32 %v2582_v14, %v1015_v1  ;;  %v1370_v6 = vpop.f32.mrf.mxu1  ;;  %v1175_v12 = vadd.f32 %v2582_v14, %v1093_v4 }
 0x175   : > { %2048 = vtanh.f32 %v1446_v63  ;;  %v1275_v7 = vpack.c.bf16 %v2045_v2, %v2041_v57  ;;  %v2047_v8 = vpop.eup %2046  ;;  %v1371_v9 = vadd.f32 %v2685_v34, %v1370_v6  ;;  %v651_v3 = vpop.permute.xlu1 %650 }
 0x176   : > { %2050 = vtanh.f32 %v1143_v59  ;;  %1586 = vst [vmem:[%s2698_s14 + $0x20] sm:$0xff] %v2047_v8 }
 0x177   : > { %2052 = vtanh.f32 %v1144_v5  ;;  %1487 = vmatmul.bf16.gmra.mxu3 %v1275_v7  ;;  %v863_v7 = vmul.f32 %v2743_v0, %v651_v3 }
 0x178   : > { %2054 = vtanh.f32 %v1371_v9  ;;  %v821_v27 = vpop.permute.xlu0 %820 }
 0x179   : > { %v1094_v15 = vpop.f32.mrf.mxu2  ;;  %v1017_v18 = vpop.f32.mrf.mxu0  ;;  %2056 = vtanh.f32 %v1175_v12 }
 0x17a   : > { %v1095_v16 = vadd.f32 %v1094_v15, %v891_v11  ;;  %v1448_v17 = vpop.f32.mrf.mxu3  ;;  %v1018_v28 = vadd.f32 %v1017_v18, %v860_v22 }
 0x17b   : > { %v2049_v19 = vpop.eup %2048  ;;  %v1449_v20 = vadd.f32 %v2685_v34, %v1448_v17 }
 0x17c   : > { %v2051_v21 = vpop.eup %2050  ;;  %1617 = vst [vmem:[%s2698_s14 + $0x118] sm:$0xff] %v2049_v19  ;;  %v1176_v23 = vadd.f32 %v2582_v14, %v1095_v16  ;;  %v1373_v25 = vpop.f32.mrf.mxu1  ;;  %v1145_v36 = vadd.f32 %v2582_v14, %v1018_v28 }
 0x17d   : > { %v2053_v24 = vpop.eup %2052  ;;  %2058 = vtanh.f32 %v1449_v20  ;;  %v1374_v29 = vadd.f32 %v2685_v34, %v1373_v25  ;;  %v816_v19 = vpop.permute.xlu2 %815 }
 0x17e   : > { %v2055_v26 = vpop.eup %2054  ;;  %2060 = vtanh.f32 %v1176_v23  ;;  %v1260_v30 = vpack.c.bf16 %v2053_v24, %v2051_v21 }
 0x17f   : > { %1587 = vst [vmem:[%s2698_s14 + $0x28] sm:$0xff] %v2055_v26  ;;  %2062 = vtanh.f32 %v1374_v29  ;;  %v2057_v33 = vpop.eup %2056  ;;  %v895_v26 = vmul.f32 %v2743_v0, %v811_v50  ;;  %v656_v29 = vpop.permute.xlu1 %655  ;;  %v896_v50 = vmul.f32 %v2743_v0, %v816_v19 }
 0x180   : > { %1412 = vmatmul.bf16.gmra.mxu1 %v1260_v30 }
 0x181   : > { %v1097_v32 = vpop.f32.mrf.mxu2  ;;  %v1019_v38 = vpop.f32.mrf.mxu0 }
 0x182   : > { %v1450_v37 = vpop.f32.mrf.mxu3  ;;  %v1020_v41 = vadd.f32 %v1019_v38, %v861_v31  ;;  %v1098_v44 = vadd.f32 %v1097_v32, %v892_v35  ;;  %v864_v38 = vmul.f32 %v2743_v0, %v656_v29 }
 0x183   : > { %v2059_v39 = vpop.eup %2058  ;;  %v1451_v40 = vadd.f32 %v2685_v34, %v1450_v37 }
 0x184   : > { %v2061_v42 = vpop.eup %2060  ;;  %1618 = vst [vmem:[%s2698_s14 + $0x120] sm:$0xff] %v2059_v39  ;;  %v1146_v46 = vadd.f32 %v2753_v45, %v1020_v41  ;;  %v1375_v14 = vpop.f32.mrf.mxu1  ;;  %v1177_v52 = vadd.f32 %v2753_v45, %v1098_v44 }
 0x185   : > { %2064 = vtanh.f32 %v1451_v40  ;;  %v1276_v47 = vpack.c.bf16 %v2061_v42, %v2057_v33  ;;  %v2063_v48 = vpop.eup %2062  ;;  %v1376_v49 = vadd.f32 %v2685_v34, %v1375_v14  ;;  %v661_v43 = vpop.permute.xlu2 %660 }
 0x186   : > { %2066 = vtanh.f32 %v1145_v36  ;;  %1588 = vst [vmem:[%s2698_s14 + $0x30] sm:$0xff] %v2063_v48 }
 0x187   : > { %2068 = vtanh.f32 %v1146_v46  ;;  %1492 = vmatmul.bf16.gmra.mxu3 %v1276_v47  ;;  %v865_v47 = vmul.f32 %v2743_v0, %v661_v43 }
 0x188   : > { %2070 = vtanh.f32 %v1376_v49 }
 0x189   : > { %v1099_v54 = vpop.f32.mrf.mxu2  ;;  %v1022_v57 = vpop.f32.mrf.mxu0  ;;  %2072 = vtanh.f32 %v1177_v52 }
 0x18a   : > { %v1100_v55 = vadd.f32 %v1099_v54, %v893_v51  ;;  %v1453_v56 = vpop.f32.mrf.mxu3  ;;  %v1023_v4 = vadd.f32 %v1022_v57, %v862_v61 }
 0x18b   : > { %v2065_v58 = vpop.eup %2064  ;;  %v1454_v59 = vadd.f32 %v2685_v34, %v1453_v56 }
 0x18c   : > { %v2067_v60 = vpop.eup %2066  ;;  %1619 = vst [vmem:[%s2698_s14 + $0x128] sm:$0xff] %v2065_v58  ;;  %v1178_v62 = vadd.f32 %v2753_v45, %v1100_v55  ;;  %v1378_v1 = vpop.f32.mrf.mxu1  ;;  %v1147_v11 = vadd.f32 %v2753_v45, %v1023_v4 }
 0x18d   : > { %v2069_v63 = vpop.eup %2068  ;;  %2074 = vtanh.f32 %v1454_v59  ;;  %v1379_v5 = vadd.f32 %v2685_v34, %v1378_v1  ;;  %v826_v58 = vpop.permute.xlu0 %825 }
 0x18e   : > { %v2071_v2 = vpop.eup %2070  ;;  %2076 = vtanh.f32 %v1178_v62  ;;  %v1261_v6 = vpack.c.bf16 %v2069_v63, %v2067_v60  ;;  %v666_v4 = vpop.permute.xlu2 %665 }
 0x18f   : > { %1589 = vst [vmem:[%s2698_s14 + $0x38] sm:$0xff] %v2071_v2  ;;  %2078 = vtanh.f32 %v1379_v5  ;;  %v2073_v9 = vpop.eup %2072  ;;  %v897_v2 = vmul.f32 %v2743_v0, %v821_v27 }
 0x190   : > { %1417 = vmatmul.bf16.gmra.mxu1 %v1261_v6 }
 0x191   : > { %v1102_v8 = vpop.f32.mrf.mxu2  ;;  %v1024_v13 = vpop.f32.mrf.mxu0 }
 0x192   : > { %v1455_v12 = vpop.f32.mrf.mxu3  ;;  %v1025_v17 = vadd.f32 %v1024_v13, %v863_v7  ;;  %v1103_v20 = vadd.f32 %v1102_v8, %v894_v10 }
 0x193   : > { %v2075_v15 = vpop.eup %2074  ;;  %v1456_v16 = vadd.f32 %v2685_v34, %v1455_v12  ;;  %v866_v12 = vmul.f32 %v2743_v0, %v666_v4 }
 0x194   : > { %v2077_v18 = vpop.eup %2076  ;;  %1620 = vst [vmem:[%s2698_s14 + $0x130] sm:$0xff] %v2075_v15  ;;  %v1148_v21 = vadd.f32 %v2753_v45, %v1025_v17  ;;  %v1380_v22 = vpop.f32.mrf.mxu1  ;;  %v1179_v28 = vadd.f32 %v2753_v45, %v1103_v20 }
 0x195   : > { %2080 = vtanh.f32 %v1456_v16  ;;  %v1277_v23 = vpack.c.bf16 %v2077_v18, %v2073_v9  ;;  %v2079_v24 = vpop.eup %2078  ;;  %v1381_v25 = vadd.f32 %v2685_v34, %v1380_v22  ;;  %v671_v18 = vpop.permute.xlu0 %670 }
 0x196   : > { %2082 = vtanh.f32 %v1147_v11  ;;  %1590 = vst [vmem:[%s2698_s14 + $0x40] sm:$0xff] %v2079_v24  ;;  %v867_v22 = vmul.f32 %v2743_v0, %v671_v18 }
 0x197   : > { %2084 = vtanh.f32 %v1148_v21  ;;  %1497 = vmatmul.bf16.gmra.mxu3 %v1277_v23 }
 0x198   : > { %2086 = vtanh.f32 %v1381_v25  ;;  %v898_v25 = vmul.f32 %v2743_v0, %v826_v58 }
 0x199   : > { %v1104_v30 = vpop.f32.mrf.mxu2  ;;  %v1027_v33 = vpop.f32.mrf.mxu0  ;;  %2088 = vtanh.f32 %v1179_v28 }
 0x19a   : > { %v1105_v31 = vadd.f32 %v1104_v30, %v895_v26  ;;  %v1458_v32 = vpop.f32.mrf.mxu3  ;;  %v1028_v44 = vadd.f32 %v1027_v33, %v864_v38 }
 0x19b   : > { %v2081_v35 = vpop.eup %2080  ;;  %v1459_v36 = vadd.f32 %v2685_v34, %v1458_v32 }
 0x19c   : > { %v2083_v37 = vpop.eup %2082  ;;  %1621 = vst [vmem:[%s2698_s14 + $0x138] sm:$0xff] %v2081_v35  ;;  %v1180_v39 = vadd.f32 %v2753_v45, %v1105_v31  ;;  %v1383_v41 = vpop.f32.mrf.mxu1  ;;  %v1149_v51 = vadd.f32 %v2753_v45, %v1028_v44 }
 0x19d   : > { %v2085_v40 = vpop.eup %2084  ;;  %2090 = vtanh.f32 %v1459_v36  ;;  %v1384_v46 = vadd.f32 %v2685_v34, %v1383_v41  ;;  %v831_v35 = vpop.permute.xlu1 %830 }
 0x19e   : > { %v2087_v42 = vpop.eup %2086  ;;  %2092 = vtanh.f32 %v1180_v39  ;;  %v1262_v14 = vpack.c.bf16 %v2085_v40, %v2083_v37  ;;  %v899_v41 = vmul.f32 %v2743_v0, %v831_v35 }
 0x19f   : > { %1591 = vst [vmem:[%s2698_s14 + $0x48] sm:$0xff] %v2087_v42  ;;  %2094 = vtanh.f32 %v1384_v46  ;;  %v2089_v49 = vpop.eup %2088 }
 0x1a0   : > { %1422 = vmatmul.bf16.gmra.mxu1 %v1262_v14 }
 0x1a1   : > { %v1107_v48 = vpop.f32.mrf.mxu2  ;;  %v1029_v53 = vpop.f32.mrf.mxu0 }
 0x1a2   : > { %v1460_v52 = vpop.f32.mrf.mxu3  ;;  %v1030_v56 = vadd.f32 %v1029_v53, %v865_v47  ;;  %v1108_v59 = vadd.f32 %v1107_v48, %v896_v50 }
 0x1a3   : > { %v2091_v54 = vpop.eup %2090  ;;  %v1461_v55 = vadd.f32 %v2685_v34, %v1460_v52 }
 0x1a4   : > { %v2093_v57 = vpop.eup %2092  ;;  %1622 = vst [vmem:[%s2698_s14 + $0x140] sm:$0xff] %v2091_v54  ;;  %v1150_v60 = vadd.f32 %v2753_v45, %v1030_v56  ;;  %v1385_v61 = vpop.f32.mrf.mxu1  ;;  %v1181_v3 = vadd.f32 %v2753_v45, %v1108_v59 }
 0x1a5   : > { %2096 = vtanh.f32 %v1461_v55  ;;  %v1278_v62 = vpack.c.bf16 %v2093_v57, %v2089_v49  ;;  %v2095_v63 = vpop.eup %2094  ;;  %v1386_v1 = vadd.f32 %v2685_v34, %v1385_v61 }
 0x1a6   : > { %2098 = vtanh.f32 %v1149_v51  ;;  %1592 = vst [vmem:[%s2698_s14 + $0x50] sm:$0xff] %v2095_v63 }
 0x1a7   : > { %2100 = vtanh.f32 %v1150_v60  ;;  %1502 = vmatmul.bf16.gmra.mxu3 %v1278_v62 }
 0x1a8   : > { %2102 = vtanh.f32 %v1386_v1 }
 0x1a9   : > { %v1109_v5 = vpop.f32.mrf.mxu2  ;;  %v1032_v8 = vpop.f32.mrf.mxu0  ;;  %2104 = vtanh.f32 %v1181_v3 }
 0x1aa   : > { %v1110_v6 = vadd.f32 %v1109_v5, %v897_v2  ;;  %v1463_v7 = vpop.f32.mrf.mxu3  ;;  %v1033_v19 = vadd.f32 %v1032_v8, %v866_v12 }
 0x1ab   : > { %v2097_v9 = vpop.eup %2096  ;;  %v1464_v10 = vadd.f32 %v2685_v34, %v1463_v7 }
 0x1ac   : > { %v2099_v11 = vpop.eup %2098  ;;  %1623 = vst [vmem:[%s2698_s14 + $0x148] sm:$0xff] %v2097_v9  ;;  %v1182_v13 = vadd.f32 %v2753_v45, %v1110_v6  ;;  %v1388_v16 = vpop.f32.mrf.mxu1  ;;  %v1151_v26 = vadd.f32 %v2753_v45, %v1033_v19 }
 0x1ad   : > { %v2101_v15 = vpop.eup %2100  ;;  %2106 = vtanh.f32 %v1464_v10  ;;  %v1389_v20 = vadd.f32 %v2685_v34, %v1388_v16 }
 0x1ae   : > { %v2103_v17 = vpop.eup %2102  ;;  %2108 = vtanh.f32 %v1182_v13  ;;  %v1263_v21 = vpack.c.bf16 %v2101_v15, %v2099_v11 }
 0x1af   : > { %1593 = vst [vmem:[%s2698_s14 + $0x58] sm:$0xff] %v2103_v17  ;;  %2110 = vtanh.f32 %v1389_v20  ;;  %v2105_v24 = vpop.eup %2104 }
 0x1b0   : > { %1427 = vmatmul.bf16.gmra.mxu1 %v1263_v21 }
 0x1b1   : > { %v1112_v23 = vpop.f32.mrf.mxu2  ;;  %v1034_v28 = vpop.f32.mrf.mxu0 }
 0x1b2   : > { %v1465_v27 = vpop.f32.mrf.mxu3  ;;  %v1035_v31 = vadd.f32 %v1034_v28, %v867_v22  ;;  %v1113_v33 = vadd.f32 %v1112_v23, %v898_v25 }
 0x1b3   : > { %v2107_v29 = vpop.eup %2106  ;;  %v1466_v30 = vadd.f32 %v2685_v34, %v1465_v27 }
 0x1b4   : > { %v2109_v32 = vpop.eup %2108  ;;  %1624 = vst [vmem:[%s2698_s14 + $0x150] sm:$0xff] %v2107_v29  ;;  %v1152_v36 = vadd.f32 %v2753_v45, %v1035_v31  ;;  %v1390_v37 = vpop.f32.mrf.mxu1  ;;  %v1183_v42 = vadd.f32 %v2753_v45, %v1113_v33 }
 0x1b5   : > { %2112 = vtanh.f32 %v1466_v30  ;;  %v1279_v38 = vpack.c.bf16 %v2109_v32, %v2105_v24  ;;  %v2111_v39 = vpop.eup %2110  ;;  %v1391_v40 = vadd.f32 %v2685_v34, %v1390_v37 }
 0x1b6   : > { %2114 = vtanh.f32 %v1151_v26  ;;  %1594 = vst [vmem:[%s2698_s14 + $0x60] sm:$0xff] %v2111_v39 }
 0x1b7   : > { %2116 = vtanh.f32 %v1152_v36  ;;  %1507 = vmatmul.bf16.gmra.mxu3 %v1279_v38 }
 0x1b8   : > { %2118 = vtanh.f32 %v1391_v40 }
 0x1b9   : > { %v1114_v43 = vpop.f32.mrf.mxu2  ;;  %2120 = vtanh.f32 %v1183_v42 }
 0x1ba   : > { %v1115_v44 = vadd.f32 %v1114_v43, %v899_v41  ;;  %v1468_v46 = vpop.f32.mrf.mxu3 }
 0x1bb   : > { %v2113_v14 = vpop.eup %2112  ;;  %v1469_v47 = vadd.f32 %v2685_v34, %v1468_v46 }
 0x1bc   : > { %v2115_v48 = vpop.eup %2114  ;;  %1625 = vst [vmem:[%s2698_s14 + $0x158] sm:$0xff] %v2113_v14  ;;  %v1184_v49 = vadd.f32 %v2753_v45, %v1115_v44  ;;  %v1393_v51 = vpop.f32.mrf.mxu1 }
 0x1bd   : > { %v2117_v50 = vpop.eup %2116  ;;  %2122 = vtanh.f32 %v1469_v47  ;;  %v1394_v52 = vadd.f32 %v2685_v34, %v1393_v51 }
 0x1be   : > { %v2119_v0 = vpop.eup %2118  ;;  %2124 = vtanh.f32 %v1184_v49  ;;  %v1264_v53 = vpack.c.bf16 %v2117_v50, %v2115_v48 }
 0x1bf   : > { %1595 = vst [vmem:[%s2698_s14 + $0x68] sm:$0xff] %v2119_v0  ;;  %2126 = vtanh.f32 %v1394_v52  ;;  %v2121_v54 = vpop.eup %2120 }
 0x1c0   : > { %1432 = vmatmul.bf16.gmra.mxu1 %v1264_v53 }
 0x1c2   : > { %v1470_v55 = vpop.f32.mrf.mxu3 }
 0x1c3   : > { %v2123_v56 = vpop.eup %2122  ;;  %v1471_v57 = vadd.f32 %v2685_v34, %v1470_v55 }
 0x1c4   : > { %v2125_v45 = vpop.eup %2124  ;;  %1626 = vst [vmem:[%s2698_s14 + $0x160] sm:$0xff] %v2123_v56  ;;  %v1395_v58 = vpop.f32.mrf.mxu1 }
 0x1c5   : > { %2128 = vtanh.f32 %v1471_v57  ;;  %v1280_v59 = vpack.c.bf16 %v2125_v45, %v2121_v54  ;;  %v2127_v60 = vpop.eup %2126  ;;  %v1396_v61 = vadd.f32 %v2685_v34, %v1395_v58 }
 0x1c6   : > { %1596 = vst [vmem:[%s2698_s14 + $0x70] sm:$0xff] %v2127_v60 }
 0x1c7   : > { %1512 = vmatmul.bf16.gmra.mxu3 %v1280_v59  ;;  %2130 = vtanh.f32 %v1396_v61 }
 0x1ca   : > { %v1473_v62 = vpop.f32.mrf.mxu3 }
 0x1cb   : > { %v2129_v63 = vpop.eup %2128  ;;  %v1474_v1 = vadd.f32 %v2685_v34, %v1473_v62 }
 0x1cc   : > { %1627 = vst [vmem:[%s2698_s14 + $0x168] sm:$0xff] %v2129_v63  ;;  %v1398_v2 = vpop.f32.mrf.mxu1 }
 0x1cd   : > { %2132 = vtanh.f32 %v1474_v1  ;;  %v2131_v3 = vpop.eup %2130  ;;  %v1399_v4 = vadd.f32 %v2685_v34, %v1398_v2 }
 0x1ce   : > { %1597 = vst [vmem:[%s2698_s14 + $0x78] sm:$0xff] %v2131_v3 }
 0x1cf   : > { %2134 = vtanh.f32 %v1399_v4 }
 0x1d2   : > { %v1475_v5 = vpop.f32.mrf.mxu3 }
 0x1d3   : > { %v2133_v6 = vpop.eup %2132  ;;  %v1476_v7 = vadd.f32 %v2685_v34, %v1475_v5 }
 0x1d4   : > { %1628 = vst [vmem:[%s2698_s14 + $0x170] sm:$0xff] %v2133_v6  ;;  %v1400_v8 = vpop.f32.mrf.mxu1 }
 0x1d5   : > { %2136 = vtanh.f32 %v1476_v7  ;;  %v2135_v9 = vpop.eup %2134  ;;  %v1401_v10 = vadd.f32 %v2685_v34, %v1400_v8 }
 0x1d6   : > { %1598 = vst [vmem:[%s2698_s14 + $0x80] sm:$0xff] %v2135_v9 }
 0x1d7   : > { %2138 = vtanh.f32 %v1401_v10 }
 0x1da   : > { %v1478_v11 = vpop.f32.mrf.mxu3 }
 0x1db   : > { %v2137_v12 = vpop.eup %2136  ;;  %v1479_v13 = vadd.f32 %v2685_v34, %v1478_v11 }
 0x1dc   : > { %1629 = vst [vmem:[%s2698_s14 + $0x178] sm:$0xff] %v2137_v12  ;;  %v1403_v15 = vpop.f32.mrf.mxu1 }
 0x1dd   : > { %2140 = vtanh.f32 %v1479_v13  ;;  %v2139_v16 = vpop.eup %2138  ;;  %v1404_v17 = vadd.f32 %v2685_v34, %v1403_v15 }
 0x1de   : > { %1599 = vst [vmem:[%s2698_s14 + $0x88] sm:$0xff] %v2139_v16 }
 0x1df   : > { %2142 = vtanh.f32 %v1404_v17  ;;  %v2202_v17 = vld [vmem:[%s2922_s6] ss:$0 sm:$0xff] }
 0x1e2   : > { %v1480_v18 = vpop.f32.mrf.mxu3 }
 0x1e3   : > { %v2141_v19 = vpop.eup %2140  ;;  %v1481_v20 = vadd.f32 %v2685_v34, %v1480_v18 }
 0x1e4   : > { %1630 = vst [vmem:[%s2698_s14 + $0x180] sm:$0xff] %v2141_v19  ;;  %v1405_v21 = vpop.f32.mrf.mxu1 }
 0x1e5   : > { %2144 = vtanh.f32 %v1481_v20  ;;  %v2143_v22 = vpop.eup %2142  ;;  %v1406_v23 = vadd.f32 %v2685_v34, %v1405_v21 }
 0x1e6   : > { %1600 = vst [vmem:[%s2698_s14 + $0x90] sm:$0xff] %v2143_v22 }
 0x1e7   : > { %2146 = vtanh.f32 %v1406_v23 }
 0x1ea   : > { %v1483_v24 = vpop.f32.mrf.mxu3 }
 0x1eb   : > { %v2145_v25 = vpop.eup %2144  ;;  %v1484_v26 = vadd.f32 %v2685_v34, %v1483_v24 }
 0x1ec   : > { %1631 = vst [vmem:[%s2698_s14 + $0x188] sm:$0xff] %v2145_v25 }
 0x1ed   : > { %2148 = vtanh.f32 %v1484_v26  ;;  %v1408_v27 = vpop.f32.mrf.mxu1  ;;  %v2147_v28 = vpop.eup %2146 }
 0x1ee   : > { %v1409_v29 = vadd.f32 %v2685_v34, %v1408_v27  ;;  %1601 = vst [vmem:[%s2698_s14 + $0x98] sm:$0xff] %v2147_v28 }
 0x1f0   : > { %2150 = vtanh.f32 %v1409_v29 }
 0x1f2   : > { %v1485_v30 = vpop.f32.mrf.mxu3 }
 0x1f3   : > { %v2149_v31 = vpop.eup %2148  ;;  %v1486_v32 = vadd.f32 %v2685_v34, %v1485_v30 }
 0x1f4   : > { %1632 = vst [vmem:[%s2698_s14 + $0x190] sm:$0xff] %v2149_v31 }
 0x1f5   : > { %2152 = vtanh.f32 %v1486_v32  ;;  %v1410_v33 = vpop.f32.mrf.mxu1 }
 0x1f6   : > { %v2151_v35 = vpop.eup %2150  ;;  %v1411_v36 = vadd.f32 %v2685_v34, %v1410_v33 }
 0x1f7   : > { %1602 = vst [vmem:[%s2698_s14 + $0xa0] sm:$0xff] %v2151_v35 }
 0x1f8   : > { %2154 = vtanh.f32 %v1411_v36 }
 0x1fa   : > { %v1488_v37 = vpop.f32.mrf.mxu3 }
 0x1fb   : > { %v2153_v38 = vpop.eup %2152  ;;  %v1489_v39 = vadd.f32 %v2685_v34, %v1488_v37 }
 0x1fc   : > { %1633 = vst [vmem:[%s2698_s14 + $0x198] sm:$0xff] %v2153_v38 }
 0x1fd   : > { %2156 = vtanh.f32 %v1489_v39  ;;  %v1413_v40 = vpop.f32.mrf.mxu1 }
 0x1fe   : > { %v2155_v41 = vpop.eup %2154  ;;  %v1414_v42 = vadd.f32 %v2685_v34, %v1413_v40 }
 0x1ff   : > { %1603 = vst [vmem:[%s2698_s14 + $0xa8] sm:$0xff] %v2155_v41 }
 0x200   : > { %2158 = vtanh.f32 %v1414_v42 }
 0x202   : > { %v1490_v43 = vpop.f32.mrf.mxu3 }
 0x203   : > { %v2157_v44 = vpop.eup %2156  ;;  %v1491_v46 = vadd.f32 %v2685_v34, %v1490_v43 }
 0x204   : > { %1634 = vst [vmem:[%s2698_s14 + $0x1a0] sm:$0xff] %v2157_v44 }
 0x205   : > { %2160 = vtanh.f32 %v1491_v46  ;;  %v1415_v14 = vpop.f32.mrf.mxu1 }
 0x206   : > { %v2159_v47 = vpop.eup %2158  ;;  %v1416_v48 = vadd.f32 %v2685_v34, %v1415_v14 }
 0x207   : > { %1604 = vst [vmem:[%s2698_s14 + $0xb0] sm:$0xff] %v2159_v47 }
 0x208   : > { %2162 = vtanh.f32 %v1416_v48 }
 0x20a   : > { %v1493_v49 = vpop.f32.mrf.mxu3 }
 0x20b   : > { %v2161_v50 = vpop.eup %2160  ;;  %v1494_v51 = vadd.f32 %v2685_v34, %v1493_v49 }
 0x20c   : > { %1635 = vst [vmem:[%s2698_s14 + $0x1a8] sm:$0xff] %v2161_v50 }
 0x20d   : > { %2164 = vtanh.f32 %v1494_v51  ;;  %v1418_v0 = vpop.f32.mrf.mxu1 }
 0x20e   : > { %v2163_v52 = vpop.eup %2162  ;;  %v1419_v53 = vadd.f32 %v2685_v34, %v1418_v0 }
 0x20f   : > { %1605 = vst [vmem:[%s2698_s14 + $0xb8] sm:$0xff] %v2163_v52 }
 0x210   : > { %2166 = vtanh.f32 %v1419_v53 }
 0x212   : > { %v1495_v54 = vpop.f32.mrf.mxu3 }
 0x213   : > { %v2165_v55 = vpop.eup %2164  ;;  %v1496_v56 = vadd.f32 %v2685_v34, %v1495_v54 }
 0x214   : > { %1636 = vst [vmem:[%s2698_s14 + $0x1b0] sm:$0xff] %v2165_v55 }
 0x215   : > { %2168 = vtanh.f32 %v1496_v56  ;;  %v1420_v57 = vpop.f32.mrf.mxu1 }
 0x216   : > { %v2167_v45 = vpop.eup %2166  ;;  %v1421_v58 = vadd.f32 %v2685_v34, %v1420_v57 }
 0x217   : > { %1606 = vst [vmem:[%s2698_s14 + $0xc0] sm:$0xff] %v2167_v45 }
 0x218   : > { %2170 = vtanh.f32 %v1421_v58 }
 0x21a   : > { %v1498_v59 = vpop.f32.mrf.mxu3 }
 0x21b   : > { %v2169_v60 = vpop.eup %2168  ;;  %v1499_v61 = vadd.f32 %v2685_v34, %v1498_v59 }
 0x21c   : > { %1637 = vst [vmem:[%s2698_s14 + $0x1b8] sm:$0xff] %v2169_v60 }
 0x21d   : > { %2172 = vtanh.f32 %v1499_v61  ;;  %v1423_v62 = vpop.f32.mrf.mxu1 }
 0x21e   : > { %v2171_v63 = vpop.eup %2170  ;;  %v1424_v1 = vadd.f32 %v2685_v34, %v1423_v62 }
 0x21f   : > { %1607 = vst [vmem:[%s2698_s14 + $0xc8] sm:$0xff] %v2171_v63 }
 0x220   : > { %2174 = vtanh.f32 %v1424_v1 }
 0x222   : > { %v1500_v2 = vpop.f32.mrf.mxu3 }
 0x223   : > { %v2173_v3 = vpop.eup %2172  ;;  %v1501_v4 = vadd.f32 %v2685_v34, %v1500_v2 }
 0x224   : > { %1638 = vst [vmem:[%s2698_s14 + $0x1c0] sm:$0xff] %v2173_v3 }
 0x225   : > { %2176 = vtanh.f32 %v1501_v4  ;;  %v1425_v5 = vpop.f32.mrf.mxu1 }
 0x226   : > { %v2175_v6 = vpop.eup %2174  ;;  %v1426_v7 = vadd.f32 %v2685_v34, %v1425_v5 }
 0x227   : > { %1608 = vst [vmem:[%s2698_s14 + $0xd0] sm:$0xff] %v2175_v6 }
 0x228   : > { %2178 = vtanh.f32 %v1426_v7 }
 0x22a   : > { %v1503_v8 = vpop.f32.mrf.mxu3 }
 0x22b   : > { %v2177_v9 = vpop.eup %2176  ;;  %v1504_v10 = vadd.f32 %v2685_v34, %v1503_v8 }
 0x22c   : > { %1639 = vst [vmem:[%s2698_s14 + $0x1c8] sm:$0xff] %v2177_v9 }
 0x22d   : > { %2180 = vtanh.f32 %v1504_v10  ;;  %v1428_v11 = vpop.f32.mrf.mxu1 }
 0x22e   : > { %v2179_v12 = vpop.eup %2178  ;;  %v1429_v13 = vadd.f32 %v2685_v34, %v1428_v11 }
 0x22f   : > { %1609 = vst [vmem:[%s2698_s14 + $0xd8] sm:$0xff] %v2179_v12 }
 0x230   : > { %2182 = vtanh.f32 %v1429_v13 }
 0x232   : > { %v1505_v15 = vpop.f32.mrf.mxu3 }
 0x233   : > { %v2181_v16 = vpop.eup %2180  ;;  %v1506_v18 = vadd.f32 %v2202_v17, %v1505_v15 }
 0x234   : > { %1640 = vst [vmem:[%s2698_s14 + $0x1d0] sm:$0xff] %v2181_v16 }
 0x235   : > { %2184 = vtanh.f32 %v1506_v18  ;;  %v1430_v19 = vpop.f32.mrf.mxu1 }
 0x236   : > { %v2183_v20 = vpop.eup %2182  ;;  %v1431_v21 = vadd.f32 %v2202_v17, %v1430_v19 }
 0x237   : > { %1610 = vst [vmem:[%s2698_s14 + $0xe0] sm:$0xff] %v2183_v20 }
 0x238   : > { %2186 = vtanh.f32 %v1431_v21 }
 0x23a   : > { %v1508_v34 = vpop.f32.mrf.mxu3 }
 0x23b   : > { %v2185_v22 = vpop.eup %2184  ;;  %v1509_v23 = vadd.f32 %v2202_v17, %v1508_v34 }
 0x23c   : > { %1641 = vst [vmem:[%s2698_s14 + $0x1d8] sm:$0xff] %v2185_v22 }
 0x23d   : > { %2188 = vtanh.f32 %v1509_v23  ;;  %v1433_v24 = vpop.f32.mrf.mxu1 }
 0x23e   : > { %v2187_v25 = vpop.eup %2186  ;;  %v1434_v26 = vadd.f32 %v2202_v17, %v1433_v24 }
 0x23f   : > { %1611 = vst [vmem:[%s2698_s14 + $0xe8] sm:$0xff] %v2187_v25 }
 0x240   : > { %2190 = vtanh.f32 %v1434_v26 }
 0x242   : > { %v1510_v27 = vpop.f32.mrf.mxu3 }
 0x243   : > { %v2189_v28 = vpop.eup %2188  ;;  %v1511_v29 = vadd.f32 %v2202_v17, %v1510_v27 }
 0x244   : > { %1642 = vst [vmem:[%s2698_s14 + $0x1e0] sm:$0xff] %v2189_v28 }
 0x245   : > { %2192 = vtanh.f32 %v1511_v29  ;;  %v1435_v30 = vpop.f32.mrf.mxu1 }
 0x246   : > { %v2191_v31 = vpop.eup %2190  ;;  %v1436_v32 = vadd.f32 %v2202_v17, %v1435_v30 }
 0x247   : > { %1612 = vst [vmem:[%s2698_s14 + $0xf0] sm:$0xff] %v2191_v31 }
 0x248   : > { %2194 = vtanh.f32 %v1436_v32 }
 0x24a   : > { %v1513_v33 = vpop.f32.mrf.mxu3 }
 0x24b   : > { %v2193_v35 = vpop.eup %2192  ;;  %v1514_v36 = vadd.f32 %v2202_v17, %v1513_v33 }
 0x24c   : > { %1643 = vst [vmem:[%s2698_s14 + $0x1e8] sm:$0xff] %v2193_v35 }
 0x24d   : > { %2196 = vtanh.f32 %v1514_v36 }
 0x24e   : > { %v2195_v37 = vpop.eup %2194 }
 0x24f   : > { %1613 = vst [vmem:[%s2698_s14 + $0xf8] sm:$0xff] %v2195_v37 }
 0x252   : > { %v1515_v38 = vpop.f32.mrf.mxu3 }
 0x253   : > { %v2197_v39 = vpop.eup %2196  ;;  %v1516_v40 = vadd.f32 %v2202_v17, %v1515_v38 }
 0x254   : > { %1644 = vst [vmem:[%s2698_s14 + $0x1f0] sm:$0xff] %v2197_v39 }
 0x255   : > { %2198 = vtanh.f32 %v1516_v40 }
 0x25b   : > { %v2199_v41 = vpop.eup %2198 }
 0x25c   : > { %1645 = vst [vmem:[%s2698_s14 + $0x1f8] sm:$0xff] %v2199_v41 }
 0x25d   : > { %2290 = shalt.err (!%p2287_p8)
}
 0x25e   : > { %s2340_s9 = smov 128   ;;  %s2341_s14 = smov 8  }
 0x25f   : > { %1881 = dma.vmem_to_hbm [thread:$0]  (%p2420_p5), %s1660_s8, 8192, %s1662_s13, %s1647_s15, %s2340_s9, %s2340_s9, %s2341_s14  }
 0x260 PF: > { %p1898_p9 = scmp.ge.s32.totalorder %s2333_s27, 2  ;;  %s1676_s22 = sand.u32 1, %s2321_s24  }
 0x261   : > { %s1677_s23 = scalar_lea.sflag [#allocation4], %s1676_s22 }
 0x262   : > { %p1891_p10 = pnand %p1898_p9, %p2424_p6 }
 0x264   : > { %p1892_p11 = pneg %p1891_p10 }
 0x266   : > { %2316 = dma.done.wait (%p1892_p11), %s1677_s23, 8192  }
 0x267   : > { %2318 = vsyncadd (%p1892_p11), %s1677_s23, 4294959104  ;;  %p19_p12 = scmp.ge.s32.totalorder %s2407_s30, 6   ;;  %s2927_s24 = smov %s2325_s25 }
 0x268   : > { %s2928_s25 = smov %s2329_s26  ;;  %s2929_s26 = smov %s2418_s10 }
 0x269   : > { %s2930_s27 = smov %s2407_s30  ;;  %21 = sbr.rel (!%p19_p12) target bundleno = 5 (0x5), region = 95 }
 0x26e   :  { %1683 = vsyncpa [#allocation3], 1 }
 0x26f   :  { %1685 = vsyncpa [#allocation3 + $0x1], 1 }
 0x270   :  { %1686 = vsyncpa [#allocation6], 1 }
 0x271   :  { %1687 = vsyncpa [#allocation4], 1 }
 0x272   :  { %1689 = vsyncpa [#allocation4 + $0x1], 1 }

</bundles_post_ra>
